<compile_context>
chip_gen: v7x
topology: tpu7x:2x2x1
jax: 0.10.0
libtpu: 0.0.40
codegen_flags: <defaults>
</compile_context>

<pallas_src>
import functools

import jax
import jax.numpy as jnp
from jax.experimental import pallas as pl
from jax.experimental.pallas import tpu as pltpu


def lstm_reg_kernel(x_ref, wih0_ref, b0_ref, whh0_ref, wih1_ref, whh1_ref,
                    b1_ref, wreg_ref, breg_ref, o_ref, gx0_ref, hs_ref,
                    *, seq_len, batch, hidden_size, out_size):
    """Whole-sequence 2-layer LSTM + linear head in a single invocation.

    x_ref    : (S*B, I)   inputs (t-major, then batch), f32 or bf16
    wih0_ref : (I, 4H)    layer-0 input weights (pre-transposed), f32/bf16
    b0_ref   : (1, 4H)    layer-0 fused bias (b_ih + b_hh), f32
    whh0_ref : (H, 4H)    layer-0 recurrent weights (pre-transposed), f32
    wih1_ref : (H, 4H)    layer-1 input weights (pre-transposed), f32
    whh1_ref : (H, 4H)    layer-1 recurrent weights (pre-transposed), f32
    b1_ref   : (1, 4H)    layer-1 fused bias, f32
    wreg_ref : (O, H)     regression head weight (PyTorch-native layout), f32
    breg_ref : (1, O)     regression head bias, f32
    o_ref    : (S*B, O)   output
    gx0_ref  : (S*B, 4H)  scratch: precomputed layer-0 input gate terms
    hs_ref   : (S*B, H)   scratch: layer-1 hidden sequence
    """
    S, B, H = seq_len, batch, hidden_size

    # Off the serial chain: layer-0 input contribution for every timestep as a
    # single dense matmul (bf16-capable operands), fused bias folded in,
    # f32 accumulation.
    gx0_ref[...] = (
        jnp.dot(x_ref[...], wih0_ref[...], preferred_element_type=jnp.float32)
        + b0_ref[...])

    # Hoist weight loads and the layer-1 bias broadcast out of the time loop
    # (JAX does not CSE broadcast_in_dim).  Recurrent-path weights stay f32:
    # the per-step matmuls are latency-bound, so bf16 would only add a VPU
    # cast to the serial chain.
    whh0 = whh0_ref[...]
    wih1 = wih1_ref[...]
    whh1 = whh1_ref[...]
    b1b = jnp.broadcast_to(b1_ref[...], (B, 4 * H))

    def gates_to_hc(gates, c_prev):
        # PyTorch gate order [i, f, g, o]; elementwise/EUP math in f32.
        # TODO(synk): with H=32 these 32-lane slices run at 25% lane occupancy;
        # a full-lane sigmoid/tanh + pltpu.roll alignment could trade VPU/EUP
        # density against extra transcendental width (measure before adopting).
        i = jax.nn.sigmoid(gates[:, 0 * H:1 * H])
        f = jax.nn.sigmoid(gates[:, 1 * H:2 * H])
        g = jnp.tanh(gates[:, 2 * H:3 * H])
        o = jax.nn.sigmoid(gates[:, 3 * H:4 * H])
        c_new = f * c_prev + i * g
        h_new = o * jnp.tanh(c_new)
        return h_new, c_new

    def step(t, carry):
        h0, c0, h1, c1 = carry
        row = pl.multiple_of(t * B, B)
        # Independent of layer-0 at step t: can be hoisted/overlapped by the
        # scheduler under partial unroll (comes off the serial chain).
        r1 = jnp.dot(h1, whh1, preferred_element_type=jnp.float32)
        # Layer 0: only the recurrent matmul sits on the serial path.
        g0 = gx0_ref[pl.ds(row, B), :] + jnp.dot(
            h0, whh0, preferred_element_type=jnp.float32)
        h0, c0 = gates_to_hc(g0, c0)
        # Layer 1: one serial MXU push (h0_t @ W_ih1); no lane concat.
        g1 = jnp.dot(h0, wih1, preferred_element_type=jnp.float32) + r1 + b1b
        h1, c1 = gates_to_hc(g1, c1)
        hs_ref[pl.ds(row, B), :] = h1
        return h0, c0, h1, c1

    # TODO(synk): hold whh0 / wih1 / whh1 resident in the MXU via
    # pltpu.matmul_push_rhs / matmul_acc_lhs / matmul_pop to avoid re-streaming
    # the RHS every timestep (and, on v6e/v7x, fuse the two h_{t-1} dots into
    # one 256-wide block-diagonal push).
    zeros = jnp.zeros((B, H), jnp.float32)   # PyTorch default zero h0/c0
    jax.lax.fori_loop(0, S, step, (zeros, zeros, zeros, zeros),
                      unroll=min(S, 8))

    # Regression head, hoisted off the recurrence.
    hs = hs_ref[...]
    if out_size == 1:
        # O=1: VPU multiply + lane reduction beats an N=1 MXU matmul.
        head = jnp.sum(hs * wreg_ref[...], axis=-1, keepdims=True)
    else:
        # General O: MXU dot with trans_b (wreg is (O, H)).
        head = jax.lax.dot_general(hs, wreg_ref[...],
                                   (((1,), (1,)), ((), ())),
                                   preferred_element_type=jnp.float32)
    o_ref[...] = (head + breg_ref[...]).astype(o_ref.dtype)


def lstm_reg_forward(x, params, hidden_size, output_size, *,
                     matmul_dtype=jnp.float32):
    """x: (S, B, I) float32.  params are pre-transposed / pre-fused.

    matmul_dtype only affects the big off-chain x @ W_ih0 matmul (operands x
    and W_ih0).  The recurrence and all gate/cell math stay f32 on every
    generation (v5e has no bf16 VPU/EUP; the per-step dots are latency-bound).
    """
    S, B, I = x.shape
    H, O = hidden_size, output_size
    wih0_t, b0, whh0_t, wih1_t, whh1_t, b1, wreg, breg = params

    # Pad batch up to a full sublane group (multiple of 8) so the M dim of
    # every gate matmul fills the (8,128) vreg tile; pad rows are dropped.
    Bp = ((B + 7) // 8) * 8
    if Bp != B:
        x = jnp.pad(x, ((0, 0), (0, Bp - B), (0, 0)))
    x2d = x.reshape(S * Bp, I).astype(matmul_dtype)

    # Only the off-chain gx0 matmul operands are cast; everything else f32.
    wih0_c = wih0_t.astype(matmul_dtype)
    whh0_c = whh0_t.astype(jnp.float32)
    wih1_c = wih1_t.astype(jnp.float32)
    whh1_c = whh1_t.astype(jnp.float32)
    wreg_c = wreg.astype(jnp.float32)
    b0 = b0.astype(jnp.float32)
    b1 = b1.astype(jnp.float32)
    breg = breg.astype(jnp.float32)

    kernel = functools.partial(lstm_reg_kernel, seq_len=S, batch=Bp,
                               hidden_size=H, out_size=O)
    vmem = pl.BlockSpec(memory_space=pltpu.MemorySpace.VMEM)

    # TODO(synk): on v7x, split Bp across the two TensorCores (batch grid axis
    # marked "parallel" or pl.core_map) once the per-core batch fills >=8
    # sublanes, and switch to a sequence-chunk grid ("arbitrary", h/c carried
    # in scratch) before S*Bp*(I+5H+O)*4 bytes approaches v7x's 64 MiB VMEM.
    y2d = pl.pallas_call(
        kernel,
        out_shape=jax.ShapeDtypeStruct((S * Bp, O), jnp.float32),
        in_specs=[vmem] * 9,
        out_specs=vmem,
        scratch_shapes=[
            pltpu.VMEM((S * Bp, 4 * H), jnp.float32),   # layer-0 input gates
            pltpu.VMEM((S * Bp, H), jnp.float32),       # layer-1 hidden seq
        ],
        compiler_params=pltpu.CompilerParams(
            # Explicit VMEM budget: guards v7x's smaller VMEM (64 MiB physical,
            # 32 MiB scoped default); this kernel only needs ~100 KiB.
            vmem_limit_bytes=32 * 1024 * 1024,
        ),
    )(x2d, wih0_c, b0, whh0_c, wih1_c, whh1_c, b1, wreg_c, breg)

    return y2d.reshape(S, Bp, O)[:, :B, :]


def ref_forward(x, wih0, whh0, bih0, bhh0, wih1, whh1, bih1, bhh1, wreg, breg, H):
    """Pure-JAX reference matching PyTorch nn.LSTM + nn.Linear semantics."""
    S, B, _ = x.shape

    def cell(x_t, h, c, wih, whh, bih, bhh):
        gates = x_t @ wih.T + bih + h @ whh.T + bhh
        i = jax.nn.sigmoid(gates[:, :H])
        f = jax.nn.sigmoid(gates[:, H:2 * H])
        g = jnp.tanh(gates[:, 2 * H:3 * H])
        o = jax.nn.sigmoid(gates[:, 3 * H:])
        c = f * c + i * g
        h = o * jnp.tanh(c)
        return h, c

    h0 = jnp.zeros((B, H), jnp.float32)
    c0 = jnp.zeros((B, H), jnp.float32)
    h1 = jnp.zeros((B, H), jnp.float32)
    c1 = jnp.zeros((B, H), jnp.float32)
    outs = []
    for t in range(S):
        h0, c0 = cell(x[t], h0, c0, wih0, whh0, bih0, bhh0)
        h1, c1 = cell(h0, h1, c1, wih1, whh1, bih1, bhh1)
        outs.append(h1 @ wreg.T + breg)
    return jnp.stack(outs, axis=0)


if __name__ == "__main__":
    S, B, I, H, O = 8, 2, 4, 32, 1   # seq, batch, input_size, hidden_size, output_size

    key = jax.random.PRNGKey(0)
    ks = jax.random.split(key, 11)
    bound = 1.0 / (H ** 0.5)

    def u(k, shape):
        return jax.random.uniform(k, shape, jnp.float32, -bound, bound)

    # PyTorch-native parameter layouts.
    wih0 = u(ks[0], (4 * H, I))
    whh0 = u(ks[1], (4 * H, H))
    bih0 = u(ks[2], (4 * H,))
    bhh0 = u(ks[3], (4 * H,))
    wih1 = u(ks[4], (4 * H, H))
    whh1 = u(ks[5], (4 * H, H))
    bih1 = u(ks[6], (4 * H,))
    bhh1 = u(ks[7], (4 * H,))
    wreg = u(ks[8], (O, H))
    breg = u(ks[9], (O,))

    x = jax.random.normal(ks[10], (S, B, I), jnp.float32)

    # Pre-transpose / pre-fuse for the kernel (plain-JAX glue):
    #   layer 0: W_ih^T, fused bias (b_ih + b_hh), W_hh^T
    #   layer 1: W_ih^T, W_hh^T (kept separate -> no per-step concat), fused bias
    #   head:    W in native (O, H) layout, bias
    params = (
        wih0.T, (bih0 + bhh0)[None, :], whh0.T,
        wih1.T, whh1.T, (bih1 + bhh1)[None, :],
        wreg, breg[None, :],
    )

    y_ref = ref_forward(x, wih0, whh0, bih0, bhh0,
                        wih1, whh1, bih1, bhh1, wreg, breg, H)

    # f32 everywhere: tight check.
    y = lstm_reg_forward(x, params, H, O, matmul_dtype=jnp.float32)
    jax.block_until_ready(y)
    assert y.shape == (S, B, O)
    assert jnp.allclose(y, y_ref, atol=5e-5, rtol=5e-5), \
        float(jnp.max(jnp.abs(y - y_ref)))

    # bf16 operands for the off-chain x @ W_ih0 matmul only; the recurrence
    # and all gate/cell math stay f32.
    y_bf16 = lstm_reg_forward(x, params, H, O, matmul_dtype=jnp.bfloat16)
    jax.block_until_ready(y_bf16)
    assert y_bf16.shape == (S, B, O)
    assert jnp.allclose(y_bf16, y_ref, atol=5e-2, rtol=5e-2), \
        float(jnp.max(jnp.abs(y_bf16 - y_ref)))

    print("KERNEL_OK")
</pallas_src>

<mosaic_0001>
module attributes {stable_mosaic.version = 11 : i64} {
  func.func @lstm_reg_kernel(%arg0: memref<64x4xf32, #tpu.memory_space<vmem>>, %arg1: memref<4x128xf32, #tpu.memory_space<vmem>>, %arg2: memref<1x128xf32, #tpu.memory_space<vmem>>, %arg3: memref<32x128xf32, #tpu.memory_space<vmem>>, %arg4: memref<32x128xf32, #tpu.memory_space<vmem>>, %arg5: memref<32x128xf32, #tpu.memory_space<vmem>>, %arg6: memref<1x128xf32, #tpu.memory_space<vmem>>, %arg7: memref<1x32xf32, #tpu.memory_space<vmem>>, %arg8: memref<1x1xf32, #tpu.memory_space<vmem>>, %arg9: memref<64x1xf32, #tpu.memory_space<vmem>>, %arg10: memref<64x128xf32, #tpu.memory_space<vmem>>, %arg11: memref<64x32xf32, #tpu.memory_space<vmem>>) attributes {dimension_semantics = [], scalar_prefetch = 0 : i64, scratch_operands = 2 : i64, tpu.core_type = #tpu.core_type<tc>} {
    %c0 = arith.constant 0 : index
    %c0_0 = arith.constant 0 : index
    %0 = vector.load %arg0[%c0, %c0_0] : memref<64x4xf32, #tpu.memory_space<vmem>>, vector<64x4xf32>
    %c0_1 = arith.constant 0 : index
    %c0_2 = arith.constant 0 : index
    %1 = vector.load %arg1[%c0_1, %c0_2] : memref<4x128xf32, #tpu.memory_space<vmem>>, vector<4x128xf32>
    %cst = arith.constant dense<0.000000e+00> : vector<64x128xf32>
    %2 = tpu.matmul %0, %1, %cst {dimension_numbers = #tpu.dot_dimension_numbers<[1], [0], [0], [1], [0, 0, 1, 1], [], []>} : vector<64x4xf32>, vector<4x128xf32>, vector<64x128xf32> -> vector<64x128xf32>
    %c0_3 = arith.constant 0 : index
    %c0_4 = arith.constant 0 : index
    %3 = vector.load %arg2[%c0_3, %c0_4] : memref<1x128xf32, #tpu.memory_space<vmem>>, vector<1x128xf32>
    %4 = vector.broadcast %3 : vector<1x128xf32> to vector<64x128xf32>
    %5 = arith.addf %2, %4 : vector<64x128xf32>
    %c0_5 = arith.constant 0 : index
    %c0_6 = arith.constant 0 : index
    %6 = vector.load %arg10[%c0_5, %c0_6] : memref<64x128xf32, #tpu.memory_space<vmem>>, vector<64x128xf32>
    tpu.vector_store %arg10[%c0_5, %c0_6], %5 {strides = array<i32>} : memref<64x128xf32, #tpu.memory_space<vmem>>, vector<64x128xf32>,
    %c0_7 = arith.constant 0 : index
    %c0_8 = arith.constant 0 : index
    %7 = vector.load %arg3[%c0_7, %c0_8] : memref<32x128xf32, #tpu.memory_space<vmem>>, vector<32x128xf32>
    %c0_9 = arith.constant 0 : index
    %c0_10 = arith.constant 0 : index
    %8 = vector.load %arg4[%c0_9, %c0_10] : memref<32x128xf32, #tpu.memory_space<vmem>>, vector<32x128xf32>
    %c0_11 = arith.constant 0 : index
    %c0_12 = arith.constant 0 : index
    %9 = vector.load %arg5[%c0_11, %c0_12] : memref<32x128xf32, #tpu.memory_space<vmem>>, vector<32x128xf32>
    %c0_13 = arith.constant 0 : index
    %c0_14 = arith.constant 0 : index
    %10 = vector.load %arg6[%c0_13, %c0_14] : memref<1x128xf32, #tpu.memory_space<vmem>>, vector<1x128xf32>
    %11 = vector.shape_cast %10 : vector<1x128xf32> to vector<1x128xf32>
    %12 = vector.broadcast %11 : vector<1x128xf32> to vector<8x128xf32>
    %cst_15 = arith.constant 0.000000e+00 : f32
    %13 = vector.broadcast %cst_15 : f32 to vector<8x32xf32>
    %c0_i32 = arith.constant 0 : i32
    %c8_i32 = arith.constant 8 : i32
    %14 = arith.muli %c0_i32, %c8_i32 : i32
    %15 = tpu.assume_multiple %14, 8 : i32
    %cst_16 = arith.constant dense<0.000000e+00> : vector<8x128xf32>
    %16 = tpu.matmul %13, %9, %cst_16 {dimension_numbers = #tpu.dot_dimension_numbers<[1], [0], [0], [1], [0, 0, 1, 1], [], []>} : vector<8x32xf32>, vector<32x128xf32>, vector<8x128xf32> -> vector<8x128xf32>
    %17 = arith.index_cast %15 : i32 to index
    %c0_17 = arith.constant 0 : index
    %18 = vector.load %arg10[%17, %c0_17] : memref<64x128xf32, #tpu.memory_space<vmem>>, vector<8x128xf32>
    %cst_18 = arith.constant dense<0.000000e+00> : vector<8x128xf32>
    %19 = tpu.matmul %13, %7, %cst_18 {dimension_numbers = #tpu.dot_dimension_numbers<[1], [0], [0], [1], [0, 0, 1, 1], [], []>} : vector<8x32xf32>, vector<32x128xf32>, vector<8x128xf32> -> vector<8x128xf32>
    %20 = arith.addf %18, %19 : vector<8x128xf32>
    %21 = vector.extract_strided_slice %20 {offsets = [0, 0], sizes = [8, 32], strides = [1, 1]} : vector<8x128xf32> to vector<8x32xf32>
    %22 = arith.negf %21 : vector<8x32xf32>
    %23 = math.exp %22 : vector<8x32xf32>
    %cst_19 = arith.constant 1.000000e+00 : f32
    %24 = vector.broadcast %cst_19 : f32 to vector<8x32xf32>
    %25 = arith.addf %24, %23 : vector<8x32xf32>
    %26 = arith.divf %24, %25 : vector<8x32xf32>
    %27 = vector.extract_strided_slice %20 {offsets = [0, 32], sizes = [8, 32], strides = [1, 1]} : vector<8x128xf32> to vector<8x32xf32>
    %28 = arith.negf %27 : vector<8x32xf32>
    %29 = math.exp %28 : vector<8x32xf32>
    %cst_20 = arith.constant 1.000000e+00 : f32
    %30 = vector.broadcast %cst_20 : f32 to vector<8x32xf32>
    %31 = arith.addf %30, %29 : vector<8x32xf32>
    %32 = arith.divf %30, %31 : vector<8x32xf32>
    %33 = vector.extract_strided_slice %20 {offsets = [0, 64], sizes = [8, 32], strides = [1, 1]} : vector<8x128xf32> to vector<8x32xf32>
    %34 = math.tanh %33 : vector<8x32xf32>
    %35 = vector.extract_strided_slice %20 {offsets = [0, 96], sizes = [8, 32], strides = [1, 1]} : vector<8x128xf32> to vector<8x32xf32>
    %36 = arith.negf %35 : vector<8x32xf32>
    %37 = math.exp %36 : vector<8x32xf32>
    %cst_21 = arith.constant 1.000000e+00 : f32
    %38 = vector.broadcast %cst_21 : f32 to vector<8x32xf32>
    %39 = arith.addf %38, %37 : vector<8x32xf32>
    %40 = arith.divf %38, %39 : vector<8x32xf32>
    %41 = arith.mulf %32, %13 : vector<8x32xf32>
    %42 = arith.mulf %26, %34 : vector<8x32xf32>
    %43 = arith.addf %41, %42 : vector<8x32xf32>
    %44 = math.tanh %43 : vector<8x32xf32>
    %45 = arith.mulf %40, %44 : vector<8x32xf32>
    %cst_22 = arith.constant dense<0.000000e+00> : vector<8x128xf32>
    %46 = tpu.matmul %45, %8, %cst_22 {dimension_numbers = #tpu.dot_dimension_numbers<[1], [0], [0], [1], [0, 0, 1, 1], [], []>} : vector<8x32xf32>, vector<32x128xf32>, vector<8x128xf32> -> vector<8x128xf32>
    %47 = arith.addf %46, %16 : vector<8x128xf32>
    %48 = arith.addf %47, %12 : vector<8x128xf32>
    %49 = vector.extract_strided_slice %48 {offsets = [0, 0], sizes = [8, 32], strides = [1, 1]} : vector<8x128xf32> to vector<8x32xf32>
    %50 = arith.negf %49 : vector<8x32xf32>
    %51 = math.exp %50 : vector<8x32xf32>
    %cst_23 = arith.constant 1.000000e+00 : f32
    %52 = vector.broadcast %cst_23 : f32 to vector<8x32xf32>
    %53 = arith.addf %52, %51 : vector<8x32xf32>
    %54 = arith.divf %52, %53 : vector<8x32xf32>
    %55 = vector.extract_strided_slice %48 {offsets = [0, 32], sizes = [8, 32], strides = [1, 1]} : vector<8x128xf32> to vector<8x32xf32>
    %56 = arith.negf %55 : vector<8x32xf32>
    %57 = math.exp %56 : vector<8x32xf32>
    %cst_24 = arith.constant 1.000000e+00 : f32
    %58 = vector.broadcast %cst_24 : f32 to vector<8x32xf32>
    %59 = arith.addf %58, %57 : vector<8x32xf32>
    %60 = arith.divf %58, %59 : vector<8x32xf32>
    %61 = vector.extract_strided_slice %48 {offsets = [0, 64], sizes = [8, 32], strides = [1, 1]} : vector<8x128xf32> to vector<8x32xf32>
    %62 = math.tanh %61 : vector<8x32xf32>
    %63 = vector.extract_strided_slice %48 {offsets = [0, 96], sizes = [8, 32], strides = [1, 1]} : vector<8x128xf32> to vector<8x32xf32>
    %64 = arith.negf %63 : vector<8x32xf32>
    %65 = math.exp %64 : vector<8x32xf32>
    %cst_25 = arith.constant 1.000000e+00 : f32
    %66 = vector.broadcast %cst_25 : f32 to vector<8x32xf32>
    %67 = arith.addf %66, %65 : vector<8x32xf32>
    %68 = arith.divf %66, %67 : vector<8x32xf32>
    %69 = arith.mulf %60, %13 : vector<8x32xf32>
    %70 = arith.mulf %54, %62 : vector<8x32xf32>
    %71 = arith.addf %69, %70 : vector<8x32xf32>
    %72 = math.tanh %71 : vector<8x32xf32>
    %73 = arith.mulf %68, %72 : vector<8x32xf32>
    %74 = arith.index_cast %15 : i32 to index
    %c0_26 = arith.constant 0 : index
    %75 = vector.load %arg11[%74, %c0_26] : memref<64x32xf32, #tpu.memory_space<vmem>>, vector<8x32xf32>
    tpu.vector_store %arg11[%74, %c0_26], %73 {strides = array<i32>} : memref<64x32xf32, #tpu.memory_space<vmem>>, vector<8x32xf32>,
    %c1_i32 = arith.constant 1 : i32
    %c8_i32_27 = arith.constant 8 : i32
    %76 = arith.muli %c1_i32, %c8_i32_27 : i32
    %77 = tpu.assume_multiple %76, 8 : i32
    %cst_28 = arith.constant dense<0.000000e+00> : vector<8x128xf32>
    %78 = tpu.matmul %73, %9, %cst_28 {dimension_numbers = #tpu.dot_dimension_numbers<[1], [0], [0], [1], [0, 0, 1, 1], [], []>} : vector<8x32xf32>, vector<32x128xf32>, vector<8x128xf32> -> vector<8x128xf32>
    %79 = arith.index_cast %77 : i32 to index
    %c0_29 = arith.constant 0 : index
    %80 = vector.load %arg10[%79, %c0_29] : memref<64x128xf32, #tpu.memory_space<vmem>>, vector<8x128xf32>
    %cst_30 = arith.constant dense<0.000000e+00> : vector<8x128xf32>
    %81 = tpu.matmul %45, %7, %cst_30 {dimension_numbers = #tpu.dot_dimension_numbers<[1], [0], [0], [1], [0, 0, 1, 1], [], []>} : vector<8x32xf32>, vector<32x128xf32>, vector<8x128xf32> -> vector<8x128xf32>
    %82 = arith.addf %80, %81 : vector<8x128xf32>
    %83 = vector.extract_strided_slice %82 {offsets = [0, 0], sizes = [8, 32], strides = [1, 1]} : vector<8x128xf32> to vector<8x32xf32>
    %84 = arith.negf %83 : vector<8x32xf32>
    %85 = math.exp %84 : vector<8x32xf32>
    %cst_31 = arith.constant 1.000000e+00 : f32
    %86 = vector.broadcast %cst_31 : f32 to vector<8x32xf32>
    %87 = arith.addf %86, %85 : vector<8x32xf32>
    %88 = arith.divf %86, %87 : vector<8x32xf32>
    %89 = vector.extract_strided_slice %82 {offsets = [0, 32], sizes = [8, 32], strides = [1, 1]} : vector<8x128xf32> to vector<8x32xf32>
    %90 = arith.negf %89 : vector<8x32xf32>
    %91 = math.exp %90 : vector<8x32xf32>
    %cst_32 = arith.constant 1.000000e+00 : f32
    %92 = vector.broadcast %cst_32 : f32 to vector<8x32xf32>
    %93 = arith.addf %92, %91 : vector<8x32xf32>
    %94 = arith.divf %92, %93 : vector<8x32xf32>
    %95 = vector.extract_strided_slice %82 {offsets = [0, 64], sizes = [8, 32], strides = [1, 1]} : vector<8x128xf32> to vector<8x32xf32>
    %96 = math.tanh %95 : vector<8x32xf32>
    %97 = vector.extract_strided_slice %82 {offsets = [0, 96], sizes = [8, 32], strides = [1, 1]} : vector<8x128xf32> to vector<8x32xf32>
    %98 = arith.negf %97 : vector<8x32xf32>
    %99 = math.exp %98 : vector<8x32xf32>
    %cst_33 = arith.constant 1.000000e+00 : f32
    %100 = vector.broadcast %cst_33 : f32 to vector<8x32xf32>
    %101 = arith.addf %100, %99 : vector<8x32xf32>
    %102 = arith.divf %100, %101 : vector<8x32xf32>
    %103 = arith.mulf %94, %43 : vector<8x32xf32>
    %104 = arith.mulf %88, %96 : vector<8x32xf32>
    %105 = arith.addf %103, %104 : vector<8x32xf32>
    %106 = math.tanh %105 : vector<8x32xf32>
    %107 = arith.mulf %102, %106 : vector<8x32xf32>
    %cst_34 = arith.constant dense<0.000000e+00> : vector<8x128xf32>
    %108 = tpu.matmul %107, %8, %cst_34 {dimension_numbers = #tpu.dot_dimension_numbers<[1], [0], [0], [1], [0, 0, 1, 1], [], []>} : vector<8x32xf32>, vector<32x128xf32>, vector<8x128xf32> -> vector<8x128xf32>
    %109 = arith.addf %108, %78 : vector<8x128xf32>
    %110 = arith.addf %109, %12 : vector<8x128xf32>
    %111 = vector.extract_strided_slice %110 {offsets = [0, 0], sizes = [8, 32], strides = [1, 1]} : vector<8x128xf32> to vector<8x32xf32>
    %112 = arith.negf %111 : vector<8x32xf32>
    %113 = math.exp %112 : vector<8x32xf32>
    %cst_35 = arith.constant 1.000000e+00 : f32
    %114 = vector.broadcast %cst_35 : f32 to vector<8x32xf32>
    %115 = arith.addf %114, %113 : vector<8x32xf32>
    %116 = arith.divf %114, %115 : vector<8x32xf32>
    %117 = vector.extract_strided_slice %110 {offsets = [0, 32], sizes = [8, 32], strides = [1, 1]} : vector<8x128xf32> to vector<8x32xf32>
    %118 = arith.negf %117 : vector<8x32xf32>
    %119 = math.exp %118 : vector<8x32xf32>
    %cst_36 = arith.constant 1.000000e+00 : f32
    %120 = vector.broadcast %cst_36 : f32 to vector<8x32xf32>
    %121 = arith.addf %120, %119 : vector<8x32xf32>
    %122 = arith.divf %120, %121 : vector<8x32xf32>
    %123 = vector.extract_strided_slice %110 {offsets = [0, 64], sizes = [8, 32], strides = [1, 1]} : vector<8x128xf32> to vector<8x32xf32>
    %124 = math.tanh %123 : vector<8x32xf32>
    %125 = vector.extract_strided_slice %110 {offsets = [0, 96], sizes = [8, 32], strides = [1, 1]} : vector<8x128xf32> to vector<8x32xf32>
    %126 = arith.negf %125 : vector<8x32xf32>
    %127 = math.exp %126 : vector<8x32xf32>
    %cst_37 = arith.constant 1.000000e+00 : f32
    %128 = vector.broadcast %cst_37 : f32 to vector<8x32xf32>
    %129 = arith.addf %128, %127 : vector<8x32xf32>
    %130 = arith.divf %128, %129 : vector<8x32xf32>
    %131 = arith.mulf %122, %71 : vector<8x32xf32>
    %132 = arith.mulf %116, %124 : vector<8x32xf32>
    %133 = arith.addf %131, %132 : vector<8x32xf32>
    %134 = math.tanh %133 : vector<8x32xf32>
    %135 = arith.mulf %130, %134 : vector<8x32xf32>
    %136 = arith.index_cast %77 : i32 to index
    %c0_38 = arith.constant 0 : index
    %137 = vector.load %arg11[%136, %c0_38] : memref<64x32xf32, #tpu.memory_space<vmem>>, vector<8x32xf32>
    tpu.vector_store %arg11[%136, %c0_38], %135 {strides = array<i32>} : memref<64x32xf32, #tpu.memory_space<vmem>>, vector<8x32xf32>,
    %c2_i32 = arith.constant 2 : i32
    %c8_i32_39 = arith.constant 8 : i32
    %138 = arith.muli %c2_i32, %c8_i32_39 : i32
    %139 = tpu.assume_multiple %138, 8 : i32
    %cst_40 = arith.constant dense<0.000000e+00> : vector<8x128xf32>
    %140 = tpu.matmul %135, %9, %cst_40 {dimension_numbers = #tpu.dot_dimension_numbers<[1], [0], [0], [1], [0, 0, 1, 1], [], []>} : vector<8x32xf32>, vector<32x128xf32>, vector<8x128xf32> -> vector<8x128xf32>
    %141 = arith.index_cast %139 : i32 to index
    %c0_41 = arith.constant 0 : index
    %142 = vector.load %arg10[%141, %c0_41] : memref<64x128xf32, #tpu.memory_space<vmem>>, vector<8x128xf32>
    %cst_42 = arith.constant dense<0.000000e+00> : vector<8x128xf32>
    %143 = tpu.matmul %107, %7, %cst_42 {dimension_numbers = #tpu.dot_dimension_numbers<[1], [0], [0], [1], [0, 0, 1, 1], [], []>} : vector<8x32xf32>, vector<32x128xf32>, vector<8x128xf32> -> vector<8x128xf32>
    %144 = arith.addf %142, %143 : vector<8x128xf32>
    %145 = vector.extract_strided_slice %144 {offsets = [0, 0], sizes = [8, 32], strides = [1, 1]} : vector<8x128xf32> to vector<8x32xf32>
    %146 = arith.negf %145 : vector<8x32xf32>
    %147 = math.exp %146 : vector<8x32xf32>
    %cst_43 = arith.constant 1.000000e+00 : f32
    %148 = vector.broadcast %cst_43 : f32 to vector<8x32xf32>
    %149 = arith.addf %148, %147 : vector<8x32xf32>
    %150 = arith.divf %148, %149 : vector<8x32xf32>
    %151 = vector.extract_strided_slice %144 {offsets = [0, 32], sizes = [8, 32], strides = [1, 1]} : vector<8x128xf32> to vector<8x32xf32>
    %152 = arith.negf %151 : vector<8x32xf32>
    %153 = math.exp %152 : vector<8x32xf32>
    %cst_44 = arith.constant 1.000000e+00 : f32
    %154 = vector.broadcast %cst_44 : f32 to vector<8x32xf32>
    %155 = arith.addf %154, %153 : vector<8x32xf32>
    %156 = arith.divf %154, %155 : vector<8x32xf32>
    %157 = vector.extract_strided_slice %144 {offsets = [0, 64], sizes = [8, 32], strides = [1, 1]} : vector<8x128xf32> to vector<8x32xf32>
    %158 = math.tanh %157 : vector<8x32xf32>
    %159 = vector.extract_strided_slice %144 {offsets = [0, 96], sizes = [8, 32], strides = [1, 1]} : vector<8x128xf32> to vector<8x32xf32>
    %160 = arith.negf %159 : vector<8x32xf32>
    %161 = math.exp %160 : vector<8x32xf32>
    %cst_45 = arith.constant 1.000000e+00 : f32
    %162 = vector.broadcast %cst_45 : f32 to vector<8x32xf32>
    %163 = arith.addf %162, %161 : vector<8x32xf32>
    %164 = arith.divf %162, %163 : vector<8x32xf32>
    %165 = arith.mulf %156, %105 : vector<8x32xf32>
    %166 = arith.mulf %150, %158 : vector<8x32xf32>
    %167 = arith.addf %165, %166 : vector<8x32xf32>
    %168 = math.tanh %167 : vector<8x32xf32>
    %169 = arith.mulf %164, %168 : vector<8x32xf32>
    %cst_46 = arith.constant dense<0.000000e+00> : vector<8x128xf32>
    %170 = tpu.matmul %169, %8, %cst_46 {dimension_numbers = #tpu.dot_dimension_numbers<[1], [0], [0], [1], [0, 0, 1, 1], [], []>} : vector<8x32xf32>, vector<32x128xf32>, vector<8x128xf32> -> vector<8x128xf32>
    %171 = arith.addf %170, %140 : vector<8x128xf32>
    %172 = arith.addf %171, %12 : vector<8x128xf32>
    %173 = vector.extract_strided_slice %172 {offsets = [0, 0], sizes = [8, 32], strides = [1, 1]} : vector<8x128xf32> to vector<8x32xf32>
    %174 = arith.negf %173 : vector<8x32xf32>
    %175 = math.exp %174 : vector<8x32xf32>
    %cst_47 = arith.constant 1.000000e+00 : f32
    %176 = vector.broadcast %cst_47 : f32 to vector<8x32xf32>
    %177 = arith.addf %176, %175 : vector<8x32xf32>
    %178 = arith.divf %176, %177 : vector<8x32xf32>
    %179 = vector.extract_strided_slice %172 {offsets = [0, 32], sizes = [8, 32], strides = [1, 1]} : vector<8x128xf32> to vector<8x32xf32>
    %180 = arith.negf %179 : vector<8x32xf32>
    %181 = math.exp %180 : vector<8x32xf32>
    %cst_48 = arith.constant 1.000000e+00 : f32
    %182 = vector.broadcast %cst_48 : f32 to vector<8x32xf32>
    %183 = arith.addf %182, %181 : vector<8x32xf32>
    %184 = arith.divf %182, %183 : vector<8x32xf32>
    %185 = vector.extract_strided_slice %172 {offsets = [0, 64], sizes = [8, 32], strides = [1, 1]} : vector<8x128xf32> to vector<8x32xf32>
    %186 = math.tanh %185 : vector<8x32xf32>
    %187 = vector.extract_strided_slice %172 {offsets = [0, 96], sizes = [8, 32], strides = [1, 1]} : vector<8x128xf32> to vector<8x32xf32>
    %188 = arith.negf %187 : vector<8x32xf32>
    %189 = math.exp %188 : vector<8x32xf32>
    %cst_49 = arith.constant 1.000000e+00 : f32
    %190 = vector.broadcast %cst_49 : f32 to vector<8x32xf32>
    %191 = arith.addf %190, %189 : vector<8x32xf32>
    %192 = arith.divf %190, %191 : vector<8x32xf32>
    %193 = arith.mulf %184, %133 : vector<8x32xf32>
    %194 = arith.mulf %178, %186 : vector<8x32xf32>
    %195 = arith.addf %193, %194 : vector<8x32xf32>
    %196 = math.tanh %195 : vector<8x32xf32>
    %197 = arith.mulf %192, %196 : vector<8x32xf32>
    %198 = arith.index_cast %139 : i32 to index
    %c0_50 = arith.constant 0 : index
    %199 = vector.load %arg11[%198, %c0_50] : memref<64x32xf32, #tpu.memory_space<vmem>>, vector<8x32xf32>
    tpu.vector_store %arg11[%198, %c0_50], %197 {strides = array<i32>} : memref<64x32xf32, #tpu.memory_space<vmem>>, vector<8x32xf32>,
    %c3_i32 = arith.constant 3 : i32
    %c8_i32_51 = arith.constant 8 : i32
    %200 = arith.muli %c3_i32, %c8_i32_51 : i32
    %201 = tpu.assume_multiple %200, 8 : i32
    %cst_52 = arith.constant dense<0.000000e+00> : vector<8x128xf32>
    %202 = tpu.matmul %197, %9, %cst_52 {dimension_numbers = #tpu.dot_dimension_numbers<[1], [0], [0], [1], [0, 0, 1, 1], [], []>} : vector<8x32xf32>, vector<32x128xf32>, vector<8x128xf32> -> vector<8x128xf32>
    %203 = arith.index_cast %201 : i32 to index
    %c0_53 = arith.constant 0 : index
    %204 = vector.load %arg10[%203, %c0_53] : memref<64x128xf32, #tpu.memory_space<vmem>>, vector<8x128xf32>
    %cst_54 = arith.constant dense<0.000000e+00> : vector<8x128xf32>
    %205 = tpu.matmul %169, %7, %cst_54 {dimension_numbers = #tpu.dot_dimension_numbers<[1], [0], [0], [1], [0, 0, 1, 1], [], []>} : vector<8x32xf32>, vector<32x128xf32>, vector<8x128xf32> -> vector<8x128xf32>
    %206 = arith.addf %204, %205 : vector<8x128xf32>
    %207 = vector.extract_strided_slice %206 {offsets = [0, 0], sizes = [8, 32], strides = [1, 1]} : vector<8x128xf32> to vector<8x32xf32>
    %208 = arith.negf %207 : vector<8x32xf32>
    %209 = math.exp %208 : vector<8x32xf32>
    %cst_55 = arith.constant 1.000000e+00 : f32
    %210 = vector.broadcast %cst_55 : f32 to vector<8x32xf32>
    %211 = arith.addf %210, %209 : vector<8x32xf32>
    %212 = arith.divf %210, %211 : vector<8x32xf32>
    %213 = vector.extract_strided_slice %206 {offsets = [0, 32], sizes = [8, 32], strides = [1, 1]} : vector<8x128xf32> to vector<8x32xf32>
    %214 = arith.negf %213 : vector<8x32xf32>
    %215 = math.exp %214 : vector<8x32xf32>
    %cst_56 = arith.constant 1.000000e+00 : f32
    %216 = vector.broadcast %cst_56 : f32 to vector<8x32xf32>
    %217 = arith.addf %216, %215 : vector<8x32xf32>
    %218 = arith.divf %216, %217 : vector<8x32xf32>
    %219 = vector.extract_strided_slice %206 {offsets = [0, 64], sizes = [8, 32], strides = [1, 1]} : vector<8x128xf32> to vector<8x32xf32>
    %220 = math.tanh %219 : vector<8x32xf32>
    %221 = vector.extract_strided_slice %206 {offsets = [0, 96], sizes = [8, 32], strides = [1, 1]} : vector<8x128xf32> to vector<8x32xf32>
    %222 = arith.negf %221 : vector<8x32xf32>
    %223 = math.exp %222 : vector<8x32xf32>
    %cst_57 = arith.constant 1.000000e+00 : f32
    %224 = vector.broadcast %cst_57 : f32 to vector<8x32xf32>
    %225 = arith.addf %224, %223 : vector<8x32xf32>
    %226 = arith.divf %224, %225 : vector<8x32xf32>
    %227 = arith.mulf %218, %167 : vector<8x32xf32>
    %228 = arith.mulf %212, %220 : vector<8x32xf32>
    %229 = arith.addf %227, %228 : vector<8x32xf32>
    %230 = math.tanh %229 : vector<8x32xf32>
    %231 = arith.mulf %226, %230 : vector<8x32xf32>
    %cst_58 = arith.constant dense<0.000000e+00> : vector<8x128xf32>
    %232 = tpu.matmul %231, %8, %cst_58 {dimension_numbers = #tpu.dot_dimension_numbers<[1], [0], [0], [1], [0, 0, 1, 1], [], []>} : vector<8x32xf32>, vector<32x128xf32>, vector<8x128xf32> -> vector<8x128xf32>
    %233 = arith.addf %232, %202 : vector<8x128xf32>
    %234 = arith.addf %233, %12 : vector<8x128xf32>
    %235 = vector.extract_strided_slice %234 {offsets = [0, 0], sizes = [8, 32], strides = [1, 1]} : vector<8x128xf32> to vector<8x32xf32>
    %236 = arith.negf %235 : vector<8x32xf32>
    %237 = math.exp %236 : vector<8x32xf32>
    %cst_59 = arith.constant 1.000000e+00 : f32
    %238 = vector.broadcast %cst_59 : f32 to vector<8x32xf32>
    %239 = arith.addf %238, %237 : vector<8x32xf32>
    %240 = arith.divf %238, %239 : vector<8x32xf32>
    %241 = vector.extract_strided_slice %234 {offsets = [0, 32], sizes = [8, 32], strides = [1, 1]} : vector<8x128xf32> to vector<8x32xf32>
    %242 = arith.negf %241 : vector<8x32xf32>
    %243 = math.exp %242 : vector<8x32xf32>
    %cst_60 = arith.constant 1.000000e+00 : f32
    %244 = vector.broadcast %cst_60 : f32 to vector<8x32xf32>
    %245 = arith.addf %244, %243 : vector<8x32xf32>
    %246 = arith.divf %244, %245 : vector<8x32xf32>
    %247 = vector.extract_strided_slice %234 {offsets = [0, 64], sizes = [8, 32], strides = [1, 1]} : vector<8x128xf32> to vector<8x32xf32>
    %248 = math.tanh %247 : vector<8x32xf32>
    %249 = vector.extract_strided_slice %234 {offsets = [0, 96], sizes = [8, 32], strides = [1, 1]} : vector<8x128xf32> to vector<8x32xf32>
    %250 = arith.negf %249 : vector<8x32xf32>
    %251 = math.exp %250 : vector<8x32xf32>
    %cst_61 = arith.constant 1.000000e+00 : f32
    %252 = vector.broadcast %cst_61 : f32 to vector<8x32xf32>
    %253 = arith.addf %252, %251 : vector<8x32xf32>
    %254 = arith.divf %252, %253 : vector<8x32xf32>
    %255 = arith.mulf %246, %195 : vector<8x32xf32>
    %256 = arith.mulf %240, %248 : vector<8x32xf32>
    %257 = arith.addf %255, %256 : vector<8x32xf32>
    %258 = math.tanh %257 : vector<8x32xf32>
    %259 = arith.mulf %254, %258 : vector<8x32xf32>
    %260 = arith.index_cast %201 : i32 to index
    %c0_62 = arith.constant 0 : index
    %261 = vector.load %arg11[%260, %c0_62] : memref<64x32xf32, #tpu.memory_space<vmem>>, vector<8x32xf32>
    tpu.vector_store %arg11[%260, %c0_62], %259 {strides = array<i32>} : memref<64x32xf32, #tpu.memory_space<vmem>>, vector<8x32xf32>,
    %c4_i32 = arith.constant 4 : i32
    %c8_i32_63 = arith.constant 8 : i32
    %262 = arith.muli %c4_i32, %c8_i32_63 : i32
    %263 = tpu.assume_multiple %262, 8 : i32
    %cst_64 = arith.constant dense<0.000000e+00> : vector<8x128xf32>
    %264 = tpu.matmul %259, %9, %cst_64 {dimension_numbers = #tpu.dot_dimension_numbers<[1], [0], [0], [1], [0, 0, 1, 1], [], []>} : vector<8x32xf32>, vector<32x128xf32>, vector<8x128xf32> -> vector<8x128xf32>
    %265 = arith.index_cast %263 : i32 to index
    %c0_65 = arith.constant 0 : index
    %266 = vector.load %arg10[%265, %c0_65] : memref<64x128xf32, #tpu.memory_space<vmem>>, vector<8x128xf32>
    %cst_66 = arith.constant dense<0.000000e+00> : vector<8x128xf32>
    %267 = tpu.matmul %231, %7, %cst_66 {dimension_numbers = #tpu.dot_dimension_numbers<[1], [0], [0], [1], [0, 0, 1, 1], [], []>} : vector<8x32xf32>, vector<32x128xf32>, vector<8x128xf32> -> vector<8x128xf32>
    %268 = arith.addf %266, %267 : vector<8x128xf32>
    %269 = vector.extract_strided_slice %268 {offsets = [0, 0], sizes = [8, 32], strides = [1, 1]} : vector<8x128xf32> to vector<8x32xf32>
    %270 = arith.negf %269 : vector<8x32xf32>
    %271 = math.exp %270 : vector<8x32xf32>
    %cst_67 = arith.constant 1.000000e+00 : f32
    %272 = vector.broadcast %cst_67 : f32 to vector<8x32xf32>
    %273 = arith.addf %272, %271 : vector<8x32xf32>
    %274 = arith.divf %272, %273 : vector<8x32xf32>
    %275 = vector.extract_strided_slice %268 {offsets = [0, 32], sizes = [8, 32], strides = [1, 1]} : vector<8x128xf32> to vector<8x32xf32>
    %276 = arith.negf %275 : vector<8x32xf32>
    %277 = math.exp %276 : vector<8x32xf32>
    %cst_68 = arith.constant 1.000000e+00 : f32
    %278 = vector.broadcast %cst_68 : f32 to vector<8x32xf32>
    %279 = arith.addf %278, %277 : vector<8x32xf32>
    %280 = arith.divf %278, %279 : vector<8x32xf32>
    %281 = vector.extract_strided_slice %268 {offsets = [0, 64], sizes = [8, 32], strides = [1, 1]} : vector<8x128xf32> to vector<8x32xf32>
    %282 = math.tanh %281 : vector<8x32xf32>
    %283 = vector.extract_strided_slice %268 {offsets = [0, 96], sizes = [8, 32], strides = [1, 1]} : vector<8x128xf32> to vector<8x32xf32>
    %284 = arith.negf %283 : vector<8x32xf32>
    %285 = math.exp %284 : vector<8x32xf32>
    %cst_69 = arith.constant 1.000000e+00 : f32
    %286 = vector.broadcast %cst_69 : f32 to vector<8x32xf32>
    %287 = arith.addf %286, %285 : vector<8x32xf32>
    %288 = arith.divf %286, %287 : vector<8x32xf32>
    %289 = arith.mulf %280, %229 : vector<8x32xf32>
    %290 = arith.mulf %274, %282 : vector<8x32xf32>
    %291 = arith.addf %289, %290 : vector<8x32xf32>
    %292 = math.tanh %291 : vector<8x32xf32>
    %293 = arith.mulf %288, %292 : vector<8x32xf32>
    %cst_70 = arith.constant dense<0.000000e+00> : vector<8x128xf32>
    %294 = tpu.matmul %293, %8, %cst_70 {dimension_numbers = #tpu.dot_dimension_numbers<[1], [0], [0], [1], [0, 0, 1, 1], [], []>} : vector<8x32xf32>, vector<32x128xf32>, vector<8x128xf32> -> vector<8x128xf32>
    %295 = arith.addf %294, %264 : vector<8x128xf32>
    %296 = arith.addf %295, %12 : vector<8x128xf32>
    %297 = vector.extract_strided_slice %296 {offsets = [0, 0], sizes = [8, 32], strides = [1, 1]} : vector<8x128xf32> to vector<8x32xf32>
    %298 = arith.negf %297 : vector<8x32xf32>
    %299 = math.exp %298 : vector<8x32xf32>
    %cst_71 = arith.constant 1.000000e+00 : f32
    %300 = vector.broadcast %cst_71 : f32 to vector<8x32xf32>
    %301 = arith.addf %300, %299 : vector<8x32xf32>
    %302 = arith.divf %300, %301 : vector<8x32xf32>
    %303 = vector.extract_strided_slice %296 {offsets = [0, 32], sizes = [8, 32], strides = [1, 1]} : vector<8x128xf32> to vector<8x32xf32>
    %304 = arith.negf %303 : vector<8x32xf32>
    %305 = math.exp %304 : vector<8x32xf32>
    %cst_72 = arith.constant 1.000000e+00 : f32
    %306 = vector.broadcast %cst_72 : f32 to vector<8x32xf32>
    %307 = arith.addf %306, %305 : vector<8x32xf32>
    %308 = arith.divf %306, %307 : vector<8x32xf32>
    %309 = vector.extract_strided_slice %296 {offsets = [0, 64], sizes = [8, 32], strides = [1, 1]} : vector<8x128xf32> to vector<8x32xf32>
    %310 = math.tanh %309 : vector<8x32xf32>
    %311 = vector.extract_strided_slice %296 {offsets = [0, 96], sizes = [8, 32], strides = [1, 1]} : vector<8x128xf32> to vector<8x32xf32>
    %312 = arith.negf %311 : vector<8x32xf32>
    %313 = math.exp %312 : vector<8x32xf32>
    %cst_73 = arith.constant 1.000000e+00 : f32
    %314 = vector.broadcast %cst_73 : f32 to vector<8x32xf32>
    %315 = arith.addf %314, %313 : vector<8x32xf32>
    %316 = arith.divf %314, %315 : vector<8x32xf32>
    %317 = arith.mulf %308, %257 : vector<8x32xf32>
    %318 = arith.mulf %302, %310 : vector<8x32xf32>
    %319 = arith.addf %317, %318 : vector<8x32xf32>
    %320 = math.tanh %319 : vector<8x32xf32>
    %321 = arith.mulf %316, %320 : vector<8x32xf32>
    %322 = arith.index_cast %263 : i32 to index
    %c0_74 = arith.constant 0 : index
    %323 = vector.load %arg11[%322, %c0_74] : memref<64x32xf32, #tpu.memory_space<vmem>>, vector<8x32xf32>
    tpu.vector_store %arg11[%322, %c0_74], %321 {strides = array<i32>} : memref<64x32xf32, #tpu.memory_space<vmem>>, vector<8x32xf32>,
    %c5_i32 = arith.constant 5 : i32
    %c8_i32_75 = arith.constant 8 : i32
    %324 = arith.muli %c5_i32, %c8_i32_75 : i32
    %325 = tpu.assume_multiple %324, 8 : i32
    %cst_76 = arith.constant dense<0.000000e+00> : vector<8x128xf32>
    %326 = tpu.matmul %321, %9, %cst_76 {dimension_numbers = #tpu.dot_dimension_numbers<[1], [0], [0], [1], [0, 0, 1, 1], [], []>} : vector<8x32xf32>, vector<32x128xf32>, vector<8x128xf32> -> vector<8x128xf32>
    %327 = arith.index_cast %325 : i32 to index
    %c0_77 = arith.constant 0 : index
    %328 = vector.load %arg10[%327, %c0_77] : memref<64x128xf32, #tpu.memory_space<vmem>>, vector<8x128xf32>
    %cst_78 = arith.constant dense<0.000000e+00> : vector<8x128xf32>
    %329 = tpu.matmul %293, %7, %cst_78 {dimension_numbers = #tpu.dot_dimension_numbers<[1], [0], [0], [1], [0, 0, 1, 1], [], []>} : vector<8x32xf32>, vector<32x128xf32>, vector<8x128xf32> -> vector<8x128xf32>
    %330 = arith.addf %328, %329 : vector<8x128xf32>
    %331 = vector.extract_strided_slice %330 {offsets = [0, 0], sizes = [8, 32], strides = [1, 1]} : vector<8x128xf32> to vector<8x32xf32>
    %332 = arith.negf %331 : vector<8x32xf32>
    %333 = math.exp %332 : vector<8x32xf32>
    %cst_79 = arith.constant 1.000000e+00 : f32
    %334 = vector.broadcast %cst_79 : f32 to vector<8x32xf32>
    %335 = arith.addf %334, %333 : vector<8x32xf32>
    %336 = arith.divf %334, %335 : vector<8x32xf32>
    %337 = vector.extract_strided_slice %330 {offsets = [0, 32], sizes = [8, 32], strides = [1, 1]} : vector<8x128xf32> to vector<8x32xf32>
    %338 = arith.negf %337 : vector<8x32xf32>
    %339 = math.exp %338 : vector<8x32xf32>
    %cst_80 = arith.constant 1.000000e+00 : f32
    %340 = vector.broadcast %cst_80 : f32 to vector<8x32xf32>
    %341 = arith.addf %340, %339 : vector<8x32xf32>
    %342 = arith.divf %340, %341 : vector<8x32xf32>
    %343 = vector.extract_strided_slice %330 {offsets = [0, 64], sizes = [8, 32], strides = [1, 1]} : vector<8x128xf32> to vector<8x32xf32>
    %344 = math.tanh %343 : vector<8x32xf32>
    %345 = vector.extract_strided_slice %330 {offsets = [0, 96], sizes = [8, 32], strides = [1, 1]} : vector<8x128xf32> to vector<8x32xf32>
    %346 = arith.negf %345 : vector<8x32xf32>
    %347 = math.exp %346 : vector<8x32xf32>
    %cst_81 = arith.constant 1.000000e+00 : f32
    %348 = vector.broadcast %cst_81 : f32 to vector<8x32xf32>
    %349 = arith.addf %348, %347 : vector<8x32xf32>
    %350 = arith.divf %348, %349 : vector<8x32xf32>
    %351 = arith.mulf %342, %291 : vector<8x32xf32>
    %352 = arith.mulf %336, %344 : vector<8x32xf32>
    %353 = arith.addf %351, %352 : vector<8x32xf32>
    %354 = math.tanh %353 : vector<8x32xf32>
    %355 = arith.mulf %350, %354 : vector<8x32xf32>
    %cst_82 = arith.constant dense<0.000000e+00> : vector<8x128xf32>
    %356 = tpu.matmul %355, %8, %cst_82 {dimension_numbers = #tpu.dot_dimension_numbers<[1], [0], [0], [1], [0, 0, 1, 1], [], []>} : vector<8x32xf32>, vector<32x128xf32>, vector<8x128xf32> -> vector<8x128xf32>
    %357 = arith.addf %356, %326 : vector<8x128xf32>
    %358 = arith.addf %357, %12 : vector<8x128xf32>
    %359 = vector.extract_strided_slice %358 {offsets = [0, 0], sizes = [8, 32], strides = [1, 1]} : vector<8x128xf32> to vector<8x32xf32>
    %360 = arith.negf %359 : vector<8x32xf32>
    %361 = math.exp %360 : vector<8x32xf32>
    %cst_83 = arith.constant 1.000000e+00 : f32
    %362 = vector.broadcast %cst_83 : f32 to vector<8x32xf32>
    %363 = arith.addf %362, %361 : vector<8x32xf32>
    %364 = arith.divf %362, %363 : vector<8x32xf32>
    %365 = vector.extract_strided_slice %358 {offsets = [0, 32], sizes = [8, 32], strides = [1, 1]} : vector<8x128xf32> to vector<8x32xf32>
    %366 = arith.negf %365 : vector<8x32xf32>
    %367 = math.exp %366 : vector<8x32xf32>
    %cst_84 = arith.constant 1.000000e+00 : f32
    %368 = vector.broadcast %cst_84 : f32 to vector<8x32xf32>
    %369 = arith.addf %368, %367 : vector<8x32xf32>
    %370 = arith.divf %368, %369 : vector<8x32xf32>
    %371 = vector.extract_strided_slice %358 {offsets = [0, 64], sizes = [8, 32], strides = [1, 1]} : vector<8x128xf32> to vector<8x32xf32>
    %372 = math.tanh %371 : vector<8x32xf32>
    %373 = vector.extract_strided_slice %358 {offsets = [0, 96], sizes = [8, 32], strides = [1, 1]} : vector<8x128xf32> to vector<8x32xf32>
    %374 = arith.negf %373 : vector<8x32xf32>
    %375 = math.exp %374 : vector<8x32xf32>
    %cst_85 = arith.constant 1.000000e+00 : f32
    %376 = vector.broadcast %cst_85 : f32 to vector<8x32xf32>
    %377 = arith.addf %376, %375 : vector<8x32xf32>
    %378 = arith.divf %376, %377 : vector<8x32xf32>
    %379 = arith.mulf %370, %319 : vector<8x32xf32>
    %380 = arith.mulf %364, %372 : vector<8x32xf32>
    %381 = arith.addf %379, %380 : vector<8x32xf32>
    %382 = math.tanh %381 : vector<8x32xf32>
    %383 = arith.mulf %378, %382 : vector<8x32xf32>
    %384 = arith.index_cast %325 : i32 to index
    %c0_86 = arith.constant 0 : index
    %385 = vector.load %arg11[%384, %c0_86] : memref<64x32xf32, #tpu.memory_space<vmem>>, vector<8x32xf32>
    tpu.vector_store %arg11[%384, %c0_86], %383 {strides = array<i32>} : memref<64x32xf32, #tpu.memory_space<vmem>>, vector<8x32xf32>,
    %c6_i32 = arith.constant 6 : i32
    %c8_i32_87 = arith.constant 8 : i32
    %386 = arith.muli %c6_i32, %c8_i32_87 : i32
    %387 = tpu.assume_multiple %386, 8 : i32
    %cst_88 = arith.constant dense<0.000000e+00> : vector<8x128xf32>
    %388 = tpu.matmul %383, %9, %cst_88 {dimension_numbers = #tpu.dot_dimension_numbers<[1], [0], [0], [1], [0, 0, 1, 1], [], []>} : vector<8x32xf32>, vector<32x128xf32>, vector<8x128xf32> -> vector<8x128xf32>
    %389 = arith.index_cast %387 : i32 to index
    %c0_89 = arith.constant 0 : index
    %390 = vector.load %arg10[%389, %c0_89] : memref<64x128xf32, #tpu.memory_space<vmem>>, vector<8x128xf32>
    %cst_90 = arith.constant dense<0.000000e+00> : vector<8x128xf32>
    %391 = tpu.matmul %355, %7, %cst_90 {dimension_numbers = #tpu.dot_dimension_numbers<[1], [0], [0], [1], [0, 0, 1, 1], [], []>} : vector<8x32xf32>, vector<32x128xf32>, vector<8x128xf32> -> vector<8x128xf32>
    %392 = arith.addf %390, %391 : vector<8x128xf32>
    %393 = vector.extract_strided_slice %392 {offsets = [0, 0], sizes = [8, 32], strides = [1, 1]} : vector<8x128xf32> to vector<8x32xf32>
    %394 = arith.negf %393 : vector<8x32xf32>
    %395 = math.exp %394 : vector<8x32xf32>
    %cst_91 = arith.constant 1.000000e+00 : f32
    %396 = vector.broadcast %cst_91 : f32 to vector<8x32xf32>
    %397 = arith.addf %396, %395 : vector<8x32xf32>
    %398 = arith.divf %396, %397 : vector<8x32xf32>
    %399 = vector.extract_strided_slice %392 {offsets = [0, 32], sizes = [8, 32], strides = [1, 1]} : vector<8x128xf32> to vector<8x32xf32>
    %400 = arith.negf %399 : vector<8x32xf32>
    %401 = math.exp %400 : vector<8x32xf32>
    %cst_92 = arith.constant 1.000000e+00 : f32
    %402 = vector.broadcast %cst_92 : f32 to vector<8x32xf32>
    %403 = arith.addf %402, %401 : vector<8x32xf32>
    %404 = arith.divf %402, %403 : vector<8x32xf32>
    %405 = vector.extract_strided_slice %392 {offsets = [0, 64], sizes = [8, 32], strides = [1, 1]} : vector<8x128xf32> to vector<8x32xf32>
    %406 = math.tanh %405 : vector<8x32xf32>
    %407 = vector.extract_strided_slice %392 {offsets = [0, 96], sizes = [8, 32], strides = [1, 1]} : vector<8x128xf32> to vector<8x32xf32>
    %408 = arith.negf %407 : vector<8x32xf32>
    %409 = math.exp %408 : vector<8x32xf32>
    %cst_93 = arith.constant 1.000000e+00 : f32
    %410 = vector.broadcast %cst_93 : f32 to vector<8x32xf32>
    %411 = arith.addf %410, %409 : vector<8x32xf32>
    %412 = arith.divf %410, %411 : vector<8x32xf32>
    %413 = arith.mulf %404, %353 : vector<8x32xf32>
    %414 = arith.mulf %398, %406 : vector<8x32xf32>
    %415 = arith.addf %413, %414 : vector<8x32xf32>
    %416 = math.tanh %415 : vector<8x32xf32>
    %417 = arith.mulf %412, %416 : vector<8x32xf32>
    %cst_94 = arith.constant dense<0.000000e+00> : vector<8x128xf32>
    %418 = tpu.matmul %417, %8, %cst_94 {dimension_numbers = #tpu.dot_dimension_numbers<[1], [0], [0], [1], [0, 0, 1, 1], [], []>} : vector<8x32xf32>, vector<32x128xf32>, vector<8x128xf32> -> vector<8x128xf32>
    %419 = arith.addf %418, %388 : vector<8x128xf32>
    %420 = arith.addf %419, %12 : vector<8x128xf32>
    %421 = vector.extract_strided_slice %420 {offsets = [0, 0], sizes = [8, 32], strides = [1, 1]} : vector<8x128xf32> to vector<8x32xf32>
    %422 = arith.negf %421 : vector<8x32xf32>
    %423 = math.exp %422 : vector<8x32xf32>
    %cst_95 = arith.constant 1.000000e+00 : f32
    %424 = vector.broadcast %cst_95 : f32 to vector<8x32xf32>
    %425 = arith.addf %424, %423 : vector<8x32xf32>
    %426 = arith.divf %424, %425 : vector<8x32xf32>
    %427 = vector.extract_strided_slice %420 {offsets = [0, 32], sizes = [8, 32], strides = [1, 1]} : vector<8x128xf32> to vector<8x32xf32>
    %428 = arith.negf %427 : vector<8x32xf32>
    %429 = math.exp %428 : vector<8x32xf32>
    %cst_96 = arith.constant 1.000000e+00 : f32
    %430 = vector.broadcast %cst_96 : f32 to vector<8x32xf32>
    %431 = arith.addf %430, %429 : vector<8x32xf32>
    %432 = arith.divf %430, %431 : vector<8x32xf32>
    %433 = vector.extract_strided_slice %420 {offsets = [0, 64], sizes = [8, 32], strides = [1, 1]} : vector<8x128xf32> to vector<8x32xf32>
    %434 = math.tanh %433 : vector<8x32xf32>
    %435 = vector.extract_strided_slice %420 {offsets = [0, 96], sizes = [8, 32], strides = [1, 1]} : vector<8x128xf32> to vector<8x32xf32>
    %436 = arith.negf %435 : vector<8x32xf32>
    %437 = math.exp %436 : vector<8x32xf32>
    %cst_97 = arith.constant 1.000000e+00 : f32
    %438 = vector.broadcast %cst_97 : f32 to vector<8x32xf32>
    %439 = arith.addf %438, %437 : vector<8x32xf32>
    %440 = arith.divf %438, %439 : vector<8x32xf32>
    %441 = arith.mulf %432, %381 : vector<8x32xf32>
    %442 = arith.mulf %426, %434 : vector<8x32xf32>
    %443 = arith.addf %441, %442 : vector<8x32xf32>
    %444 = math.tanh %443 : vector<8x32xf32>
    %445 = arith.mulf %440, %444 : vector<8x32xf32>
    %446 = arith.index_cast %387 : i32 to index
    %c0_98 = arith.constant 0 : index
    %447 = vector.load %arg11[%446, %c0_98] : memref<64x32xf32, #tpu.memory_space<vmem>>, vector<8x32xf32>
    tpu.vector_store %arg11[%446, %c0_98], %445 {strides = array<i32>} : memref<64x32xf32, #tpu.memory_space<vmem>>, vector<8x32xf32>,
    %c7_i32 = arith.constant 7 : i32
    %c8_i32_99 = arith.constant 8 : i32
    %448 = arith.muli %c7_i32, %c8_i32_99 : i32
    %449 = tpu.assume_multiple %448, 8 : i32
    %cst_100 = arith.constant dense<0.000000e+00> : vector<8x128xf32>
    %450 = tpu.matmul %445, %9, %cst_100 {dimension_numbers = #tpu.dot_dimension_numbers<[1], [0], [0], [1], [0, 0, 1, 1], [], []>} : vector<8x32xf32>, vector<32x128xf32>, vector<8x128xf32> -> vector<8x128xf32>
    %451 = arith.index_cast %449 : i32 to index
    %c0_101 = arith.constant 0 : index
    %452 = vector.load %arg10[%451, %c0_101] : memref<64x128xf32, #tpu.memory_space<vmem>>, vector<8x128xf32>
    %cst_102 = arith.constant dense<0.000000e+00> : vector<8x128xf32>
    %453 = tpu.matmul %417, %7, %cst_102 {dimension_numbers = #tpu.dot_dimension_numbers<[1], [0], [0], [1], [0, 0, 1, 1], [], []>} : vector<8x32xf32>, vector<32x128xf32>, vector<8x128xf32> -> vector<8x128xf32>
    %454 = arith.addf %452, %453 : vector<8x128xf32>
    %455 = vector.extract_strided_slice %454 {offsets = [0, 0], sizes = [8, 32], strides = [1, 1]} : vector<8x128xf32> to vector<8x32xf32>
    %456 = arith.negf %455 : vector<8x32xf32>
    %457 = math.exp %456 : vector<8x32xf32>
    %cst_103 = arith.constant 1.000000e+00 : f32
    %458 = vector.broadcast %cst_103 : f32 to vector<8x32xf32>
    %459 = arith.addf %458, %457 : vector<8x32xf32>
    %460 = arith.divf %458, %459 : vector<8x32xf32>
    %461 = vector.extract_strided_slice %454 {offsets = [0, 32], sizes = [8, 32], strides = [1, 1]} : vector<8x128xf32> to vector<8x32xf32>
    %462 = arith.negf %461 : vector<8x32xf32>
    %463 = math.exp %462 : vector<8x32xf32>
    %cst_104 = arith.constant 1.000000e+00 : f32
    %464 = vector.broadcast %cst_104 : f32 to vector<8x32xf32>
    %465 = arith.addf %464, %463 : vector<8x32xf32>
    %466 = arith.divf %464, %465 : vector<8x32xf32>
    %467 = vector.extract_strided_slice %454 {offsets = [0, 64], sizes = [8, 32], strides = [1, 1]} : vector<8x128xf32> to vector<8x32xf32>
    %468 = math.tanh %467 : vector<8x32xf32>
    %469 = vector.extract_strided_slice %454 {offsets = [0, 96], sizes = [8, 32], strides = [1, 1]} : vector<8x128xf32> to vector<8x32xf32>
    %470 = arith.negf %469 : vector<8x32xf32>
    %471 = math.exp %470 : vector<8x32xf32>
    %cst_105 = arith.constant 1.000000e+00 : f32
    %472 = vector.broadcast %cst_105 : f32 to vector<8x32xf32>
    %473 = arith.addf %472, %471 : vector<8x32xf32>
    %474 = arith.divf %472, %473 : vector<8x32xf32>
    %475 = arith.mulf %466, %415 : vector<8x32xf32>
    %476 = arith.mulf %460, %468 : vector<8x32xf32>
    %477 = arith.addf %475, %476 : vector<8x32xf32>
    %478 = math.tanh %477 : vector<8x32xf32>
    %479 = arith.mulf %474, %478 : vector<8x32xf32>
    %cst_106 = arith.constant dense<0.000000e+00> : vector<8x128xf32>
    %480 = tpu.matmul %479, %8, %cst_106 {dimension_numbers = #tpu.dot_dimension_numbers<[1], [0], [0], [1], [0, 0, 1, 1], [], []>} : vector<8x32xf32>, vector<32x128xf32>, vector<8x128xf32> -> vector<8x128xf32>
    %481 = arith.addf %480, %450 : vector<8x128xf32>
    %482 = arith.addf %481, %12 : vector<8x128xf32>
    %483 = vector.extract_strided_slice %482 {offsets = [0, 0], sizes = [8, 32], strides = [1, 1]} : vector<8x128xf32> to vector<8x32xf32>
    %484 = arith.negf %483 : vector<8x32xf32>
    %485 = math.exp %484 : vector<8x32xf32>
    %cst_107 = arith.constant 1.000000e+00 : f32
    %486 = vector.broadcast %cst_107 : f32 to vector<8x32xf32>
    %487 = arith.addf %486, %485 : vector<8x32xf32>
    %488 = arith.divf %486, %487 : vector<8x32xf32>
    %489 = vector.extract_strided_slice %482 {offsets = [0, 32], sizes = [8, 32], strides = [1, 1]} : vector<8x128xf32> to vector<8x32xf32>
    %490 = arith.negf %489 : vector<8x32xf32>
    %491 = math.exp %490 : vector<8x32xf32>
    %cst_108 = arith.constant 1.000000e+00 : f32
    %492 = vector.broadcast %cst_108 : f32 to vector<8x32xf32>
    %493 = arith.addf %492, %491 : vector<8x32xf32>
    %494 = arith.divf %492, %493 : vector<8x32xf32>
    %495 = vector.extract_strided_slice %482 {offsets = [0, 64], sizes = [8, 32], strides = [1, 1]} : vector<8x128xf32> to vector<8x32xf32>
    %496 = math.tanh %495 : vector<8x32xf32>
    %497 = vector.extract_strided_slice %482 {offsets = [0, 96], sizes = [8, 32], strides = [1, 1]} : vector<8x128xf32> to vector<8x32xf32>
    %498 = arith.negf %497 : vector<8x32xf32>
    %499 = math.exp %498 : vector<8x32xf32>
    %cst_109 = arith.constant 1.000000e+00 : f32
    %500 = vector.broadcast %cst_109 : f32 to vector<8x32xf32>
    %501 = arith.addf %500, %499 : vector<8x32xf32>
    %502 = arith.divf %500, %501 : vector<8x32xf32>
    %503 = arith.mulf %494, %443 : vector<8x32xf32>
    %504 = arith.mulf %488, %496 : vector<8x32xf32>
    %505 = arith.addf %503, %504 : vector<8x32xf32>
    %506 = math.tanh %505 : vector<8x32xf32>
    %507 = arith.mulf %502, %506 : vector<8x32xf32>
    %508 = arith.index_cast %449 : i32 to index
    %c0_110 = arith.constant 0 : index
    %509 = vector.load %arg11[%508, %c0_110] : memref<64x32xf32, #tpu.memory_space<vmem>>, vector<8x32xf32>
    tpu.vector_store %arg11[%508, %c0_110], %507 {strides = array<i32>} : memref<64x32xf32, #tpu.memory_space<vmem>>, vector<8x32xf32>,
    %c8_i32_111 = arith.constant 8 : i32
    %c0_112 = arith.constant 0 : index
    %c0_113 = arith.constant 0 : index
    %510 = vector.load %arg11[%c0_112, %c0_113] : memref<64x32xf32, #tpu.memory_space<vmem>>, vector<64x32xf32>
    %c0_114 = arith.constant 0 : index
    %c0_115 = arith.constant 0 : index
    %511 = vector.load %arg7[%c0_114, %c0_115] : memref<1x32xf32, #tpu.memory_space<vmem>>, vector<1x32xf32>
    %512 = vector.broadcast %511 : vector<1x32xf32> to vector<64x32xf32>
    %513 = arith.mulf %510, %512 : vector<64x32xf32>
    %cst_116 = arith.constant dense<0.000000e+00> : vector<64xf32>
    %514 = vector.multi_reduction <add>, %513, %cst_116 [1] : vector<64x32xf32> to vector<64xf32>
    %515 = vector.shape_cast %514 : vector<64xf32> to vector<64x1xf32>
    %c0_117 = arith.constant 0 : index
    %c0_118 = arith.constant 0 : index
    %516 = vector.load %arg8[%c0_117, %c0_118] : memref<1x1xf32, #tpu.memory_space<vmem>>, vector<1x1xf32>
    %517 = vector.broadcast %516 : vector<1x1xf32> to vector<64x1xf32>
    %518 = arith.addf %515, %517 : vector<64x1xf32>
    %c0_119 = arith.constant 0 : index
    %c0_120 = arith.constant 0 : index
    %519 = vector.load %arg9[%c0_119, %c0_120] : memref<64x1xf32, #tpu.memory_space<vmem>>, vector<64x1xf32>
    tpu.vector_store %arg9[%c0_119, %c0_120], %518 {strides = array<i32>} : memref<64x1xf32, #tpu.memory_space<vmem>>, vector<64x1xf32>,
    return
  }
}

</mosaic_0001>

<bundles_post_ra>
// kernel: tpu_custom_call.1
= control target key start
LH: loop header
LB: loop body
LE: loop exit
PB: predicated region body
PF: predicated region fallthrough
CT: control target
= control target key end

     0   :  { %s3792_s0 = inlined_call_operand.vmem [shape: f32[64,4], index: 0, kind: input, shape index: {}]   ;;  %s3793_s1 = inlined_call_operand.vmem [shape: f32[4,128], index: 1, kind: input, shape index: {}]   ;;  %s3794_s2 = inlined_call_operand.vmem [shape: f32[1,128], index: 2, kind: input, shape index: {}]   ;;  %s3795_s3 = inlined_call_operand.vmem [shape: f32[32,128], index: 3, kind: input, shape index: {}]   ;;  %s3796_s4 = inlined_call_operand.vmem [shape: f32[32,128], index: 4, kind: input, shape index: {}]   ;;  %s3797_s5 = inlined_call_operand.hbm [shape: f32[32,128], index: 5, kind: input, shape index: {}]   ;;  %s3798_s6 = inlined_call_operand.vmem [shape: f32[1,128], index: 6, kind: input, shape index: {}]   ;;  %s3799_s7 = inlined_call_operand.vmem [shape: f32[1,32], index: 7, kind: input, shape index: {}]   ;;  %s3800_s8 = inlined_call_operand.<no memory space> [shape: f32[1,1], index: 8, kind: input, shape index: {}]   ;;  %s3801_s9 = inlined_call_operand.vmem [shape: f32[64,1], index: 9, kind: output, shape index: {}]  }
   0x1   :  { %v14_v0 = vstv %s3800_s8 }
   0x2   :  { %15 = vst [vmem:[#allocation4] sm:$0x1] %v14_v0 }
   0x3   :  { %16 = vsyncpa [#allocation6], 0  ;;  %s3263_s11 = smov [#allocation5]   ;;  %s3239_s15 = scalar_lea.hbm %s3797_s5, 512 }
   0x4   :  { %s32_s12 = sshll.u32 %s3263_s11, 4  ;;  %p3240_p0 = scmp.ne.s32.totalorder %s3797_s5, %s3239_s15  ;;  %s33_s12 = int_to_ptr.vmem [resolvable:$true] %s32_s12 }
   0x5   :  { %p3243_p1 = scmp.lt.u32.totalorder %s3239_s15, %s3797_s5 }
   0x7   :  { %p3245_p2 = pnand %p3243_p1, %p3240_p0 }
   0x9   :  { %3248 = shalt.err (!%p3245_p2)
}
   0xa   :  { %s3249_s8 = scalar_lea.vmem %s33_s12, 512  ;;  %p3254_p4 = scmp.lt.s32.totalorder %s33_s12, %s33_s12 }
   0xb   :  { %p3250_p3 = scmp.ne.s32.totalorder %s33_s12, %s3249_s8  ;;  %p3255_p5 = scmp.lt.s32.totalorder %s3249_s8, %s3249_s8 }
   0xd   :  { %p3256_p6 = por %p3255_p5, %p3254_p4 }
   0xf   :  { %p3257_p7 = pnand %p3256_p6, %p3250_p3 }
  0x11   :  { %3260 = shalt.err (!%p3257_p7)
}
  0x12   :  { %s3264_s20 = smov 128   ;;  %s3265_s21 = smov 8  }
  0x13   :  { %38 = dma.hbm_to_vmem [thread:$0]  %s3797_s5, 512, %s33_s12, [#allocation6], %s3264_s20, %s3264_s20, %s3265_s21  }
  0x14   :  { %3261 = dma.done.wait [#allocation6], 512  }
  0x15   :  { %3262 = vsyncadd [#allocation6], 4294966784  ;;  %v3266_v1 = vmov 0.0|0.0   ;;  %vm3267_vm0 = vmmov 0   ;;  %v3268_v2 = vmov 0.0   ;;  %v214_v3 = vld [vmem:[#allocation5] sm:$0xff] }
  0x16   :  { %2959 = vmatprep.subr.bf16.mxu1 %v3266_v1  ;;  %2703 = vmatprep.mubr.msk.f32.mxu1 %vm3267_vm0, %v3268_v2  ;;  %v215_v4 = vld [vmem:[#allocation5 + $0x8] sm:$0xff]  ;;  %v216_v5 = vld [vmem:[#allocation5 + $0x10] sm:$0xff]  ;;  %vm89_vm1 = vcmask 1043456   ;;  %v217_v7 = vld [vmem:[#allocation5 + $0x18] sm:$0xff]  ;;  %vm64_vm2 = vcmask 31744   ;;  %s3269_s16 = smov 64  }
  0x17   :  { %v3339_v6 = vpack.c.bf16 %v215_v4, %v214_v3  ;;  %v56_v8 = vld [vmem:[%s3793_s1] sm:$0xf]  ;;  %v3348_v10 = vpack.c.bf16 %v217_v7, %v216_v5  ;;  %v49_v11 = vld [vmem:[%s3792_s0 + $0x8] sm:$0xff]  ;;  %v208_v15 = vld [vmem:[%s3795_s3 + $0x10] sm:$0xff]  ;;  %vm225_vm3 = vcmask 261120   ;;  %vm2487_vm4 = vcmask 7168  }
  0x18   :  { %v48_v9 = vld [vmem:[%s3792_s0] sm:$0xff]  ;;  %2681 = vmatprep.subr.msk.mxu0 %vm89_vm1, %v56_v8  ;;  %v207_v13 = vld [vmem:[%s3795_s3 + $0x8] sm:$0xff]  ;;  %v209_v16 = vld [vmem:[%s3795_s3 + $0x18] sm:$0xff] }
  0x19   :  { %2961 = vmatpush3.bf16.msra.mxu1 %v3339_v6  ;;  %v206_v12 = vld [vmem:[%s3795_s3] sm:$0xff]  ;;  %2682 = vmatpush3.msk.msra.mxu0 %vm89_vm1, %v56_v8  ;;  %v3375_v17 = vpack.c.bf16 %v209_v16, %v208_v15  ;;  %v211_v38 = vld [vmem:[%s3796_s4 + $0x8] sm:$0xff]  ;;  %v50_v39 = vld [vmem:[%s3792_s0 + $0x10] sm:$0xff] }
  0x1a   :  { %2962 = vmatprep.subr.bf16.mxu1 %v3266_v1  ;;  %2683 = vmatprep.mubr.msk.f32.mxu0 %vm64_vm2, %v48_v9  ;;  %v3364_v14 = vpack.c.bf16 %v207_v13, %v206_v12  ;;  %v3396_v22 = vld [vmem:[%s3794_s2] ss:$0 sm:$0xff]  ;;  %s3270_s2 = smov 32   ;;  %v51_v41 = vld [vmem:[%s3792_s0 + $0x18] sm:$0xff]  ;;  %v212_v43 = vld [vmem:[%s3796_s4 + $0x10] sm:$0xff] }
  0x1b   :  { %2971 = vmatprep.subr.bf16.mxu0 %v3266_v1  ;;  %2684 = vmatmul.mubr.msk.f32.vlgmr.msra.gmra.mrb[0].mxu0 %vm64_vm2, %v49_v11  ;;  %v210_v37 = vld [vmem:[%s3796_s4] sm:$0xff]  ;;  %v213_v44 = vld [vmem:[%s3796_s4 + $0x18] sm:$0xff]  ;;  %v53_v45 = vld [vmem:[%s3792_s0 + $0x28] sm:$0xff] }
  0x1c   :  { %v3413_v40 = vpack.c.bf16 %v211_v38, %v210_v37  ;;  %2686 = vmatprep.mubr.msk.f32.mxu0 %vm64_vm2, %v50_v39  ;;  %v52_v42 = vld [vmem:[%s3792_s0 + $0x20] sm:$0xff]  ;;  %v3434_v46 = vpack.c.bf16 %v213_v44, %v212_v43  ;;  %v54_v47 = vld [vmem:[%s3792_s0 + $0x30] sm:$0xff]  ;;  %v55_v48 = vld [vmem:[%s3792_s0 + $0x38] sm:$0xff] }
  0x1d   :  { %2964 = vmatpush3.bf16.msra.mxu1 %v3348_v10  ;;  %v3481_v59 = vld [vmem:[%s3798_s6] ss:$0 sm:$0xff] }
  0x1e   :  { %2965 = vmatprep.subr.bf16.mxu1 %v3266_v1  ;;  %2973 = vmatpush3.bf16.msra.mxu0 %v3413_v40 }
  0x1f   :  { %2687 = vmatmul.mubr.msk.f32.gmra.mrb[2].mxu0 %vm64_vm2, %v51_v41  ;;  %2974 = vmatprep.subr.bf16.mxu0 %v3266_v1 }
  0x20   :  { %2704 = vmatmul.mubr.f32.vlgmr.msra.gmra.mrb[0].mxu1 %v3268_v2  ;;  %2689 = vmatprep.mubr.msk.f32.mxu0 %vm64_vm2, %v52_v42 }
  0x21   :  { %2967 = vmatpush3.bf16.msra.mxu1 %v3364_v14  ;;  %2714 = vmatprep.mubr.msk.f32.mxu1 %vm3267_vm0, %v3268_v2 }
  0x22   :  { %2968 = vmatprep.subr.bf16.mxu1 %v3266_v1  ;;  %2976 = vmatpush3.bf16.msra.mxu0 %v3434_v46 }
  0x23   :  { %2690 = vmatmul.mubr.msk.f32.gmra.mrb[4].mxu0 %vm64_vm2, %v53_v45  ;;  %2983 = vmatprep.subr.bf16.mxu0 %v3266_v1 }
  0x24   :  { %2692 = vmatprep.mubr.msk.f32.mxu0 %vm64_vm2, %v54_v47 }
  0x25   :  { %2970 = vmatpush3.bf16.msra.mxu1 %v3375_v17 }
  0x26   :  { %2977 = vmatprep.subr.bf16.mxu1 %v3266_v1 }
  0x27   :  { %2693 = vmatmul.mubr.msk.f32.gmra.mrb[6].mxu0 %vm64_vm2, %v55_v48 }
  0x28   :  { %2715 = vmatmul.mubr.f32.vlgmr.msra.gmra.mrb[2].mxu1 %v3268_v2  ;;  %2725 = vmatprep.mubr.msk.f32.mxu0 %vm3267_vm0, %v3268_v2 }
  0x29   :  { %2979 = vmatpush3.bf16.msra.mxu1 %v3339_v6  ;;  %2736 = vmatprep.mubr.msk.f32.mxu1 %vm3267_vm0, %v3268_v2 }
  0x2a   :  { %2980 = vmatprep.subr.bf16.mxu1 %v3266_v1 }
  0x2d   :  { %2982 = vmatpush3.bf16.msra.mxu1 %v3348_v10 }
  0x2e   :  { %2989 = vmatprep.subr.bf16.mxu1 %v3266_v1 }
  0xee   :  { %v3389_v18 = vpop.f32.mrb[0].mxu0 }
  0xef   :  { %v159_v19 = vpop.f32.mrb[1].mxu0  ;;  %v165_v0 = vadd.f32 %v3389_v18, %v3396_v22 }
  0xf0   :  { %v160_v23 = vadd.f32 %v3396_v22, %v159_v19 }
  0xf2   :  { %v3452_v52 = vpop.f32.mrb[2].mxu0 }
  0xf3   :  { %v3391_v20 = vpop.f32.mrb[0].mxu1  ;;  %v3454_v53 = vpop.f32.mrb[3].mxu0 }
  0xf4   :  { %v2705_v21 = vpop.f32.mrb[1].mxu1  ;;  %v170_v47 = vadd.f32 %v3396_v22, %v3454_v53 }
  0xf6   :  { %v3456_v54 = vpop.f32.mrb[4].mxu0 }
  0xf7   :  { %v3458_v55 = vpop.f32.mrb[5].mxu0 }
  0xfa   :  { %v3460_v56 = vpop.f32.mrb[6].mxu0 }
  0xfb   :  { %v366_v24 = vpop.f32.mrb[2].mxu1  ;;  %v3462_v57 = vpop.f32.mrb[7].mxu0 }
  0xfc   :  { %v370_v25 = vadd.f32 %v366_v24, %v160_v23  ;;  %v2716_v26 = vpop.f32.mrb[3].mxu1 }
  0xfe   :  { %3111 = vtanh.f32 %v370_v25  ;;  %v2512_v28 = vmul.f32 -1.442695, %v370_v25 }
 0x100   :  { %3113 = vpow2.f32 %v2512_v28 }
 0x108   :  { %v3112_v27 = vpop.eup %3111 }
 0x109   :  { %380 = vrot.lane.b32.xlu0 %v3112_v27, %s3269_s16 }
 0x10a   :  { %v3114_v29 = vpop.eup %3113 }
 0x10b   :  { %v374_v30 = vadd.f32 1.0, %v3114_v29 }
 0x10d   :  { %3115 = vrcp.f32 %v374_v30 }
 0x117   :  { %v3116_v31 = vpop.eup %3115 }
 0x118   :  { %v378_v34 = vmul.f32 0.0, %v3116_v31 }
 0x17b   :  { %v381_v32 = vpop.permute.xlu0 %380 }
 0x17c   :  { %v383_v33 = vmul.f32 %v3116_v31, %v381_v32 }
 0x17e   :  { %385 = vrot.lane.b32.xlu0 %v383_v33, %s3270_s2 }
 0x1f0   :  { %v386_v35 = vpop.permute.xlu0 %385 }
 0x1f1   :  { %v3401_v36 = vadd.f32 %v386_v35, %v378_v34 }
 0x1f3   :  { %3117 = vtanh.f32 %v3401_v36 }
 0x1fd   :  { %v3118_v49 = vpop.eup %3117 }
 0x1fe   :  { %391 = vrot.lane.b32.xlu1 %v3118_v49, %s3269_s16 }
 0x270   :  { %v392_v50 = vpop.permute.xlu1 %391 }
 0x271   :  { %v394_v51 = vmul.f32 %v3116_v31, %v392_v50 }
 0x273   :  { %396 = vrot.lane.b32.xlu1 %v394_v51, %s3270_s2 }
 0x2e5   :  { %v397_v58 = vpop.permute.xlu1 %396 }
 0x2e6   :  { %2726 = vmatmul.mubr.msk.f32.vlgmr.msra.gmra.mrb[8].mxu0 %vm225_vm3, %v397_v58 }
 0x2e7   :  { %2985 = vmatpush3.bf16.msra.mxu0 %v3364_v14  ;;  %2747 = vmatprep.mubr.msk.f32.mxu0 %vm3267_vm0, %v3268_v2 }
 0x2e8   :  { %2986 = vmatprep.subr.bf16.mxu0 %v3266_v1 }
 0x2eb   :  { %2988 = vmatpush3.bf16.msra.mxu0 %v3375_v17 }
 0x2ec   :  { %2995 = vmatprep.subr.bf16.mxu0 %v3266_v1 }
 0x2ee   :  { %2748 = vmatmul.mubr.msk.f32.vlgmr.msra.gmra.mrb[10].mxu0 %vm225_vm3, %v397_v58 }
 0x2ef   :  { %2997 = vmatpush3.bf16.msra.mxu0 %v3339_v6  ;;  %2769 = vmatprep.mubr.msk.f32.mxu0 %vm3267_vm0, %v3268_v2 }
 0x2f0   :  { %2998 = vmatprep.subr.bf16.mxu0 %v3266_v1 }
 0x2f3   :  { %3000 = vmatpush3.bf16.msra.mxu0 %v3348_v10 }
 0x2f4   :  { %3007 = vmatprep.subr.bf16.mxu0 %v3266_v1 }
 0x3b9   :  { %v466_v60 = vpop.f32.mrb[8].mxu0 }
 0x3ba   :  { %v467_v61 = vadd.f32 %v466_v60, %v3391_v20  ;;  %v2727_v62 = vpop.f32.mrb[9].mxu0 }
 0x3bc   :  { %v470_v63 = vadd.f32 %v3481_v59, %v467_v61 }
 0x3be   :  { %3119 = vtanh.f32 %v470_v63  ;;  %v2514_v9 = vmul.f32 -1.442695, %v470_v63 }
 0x3c1   :  { %v640_v3 = vpop.f32.mrb[10].mxu0 }
 0x3c2   :  { %v644_v4 = vadd.f32 %v640_v3, %v165_v0  ;;  %v2749_v5 = vpop.f32.mrb[11].mxu0 }
 0x3c4   :  { %3121 = vtanh.f32 %v644_v4  ;;  %v2517_v11 = vmul.f32 -1.442695, %v644_v4 }
 0x3c5   :  { %3123 = vpow2.f32 %v2514_v9 }
 0x3c6   :  { %3125 = vpow2.f32 %v2517_v11 }
 0x3c8   :  { %v3120_v7 = vpop.eup %3119 }
 0x3c9   :  { %480 = vrot.lane.b32.xlu0 %v3120_v7, %s3269_s16 }
 0x3ce   :  { %v3122_v8 = vpop.eup %3121 }
 0x3cf   :  { %654 = vrot.lane.b32.xlu1 %v3122_v8, %s3269_s16  ;;  %v3124_v12 = vpop.eup %3123 }
 0x3d0   :  { %v474_v13 = vadd.f32 1.0, %v3124_v12  ;;  %v3126_v15 = vpop.eup %3125 }
 0x3d1   :  { %v648_v16 = vadd.f32 1.0, %v3126_v15 }
 0x3d2   :  { %3127 = vrcp.f32 %v474_v13 }
 0x3d3   :  { %3129 = vrcp.f32 %v648_v16 }
 0x3dc   :  { %v3128_v18 = vpop.eup %3127 }
 0x3dd   :  { %v3130_v21 = vpop.eup %3129  ;;  %v478_v25 = vmul.f32 0.0, %v3128_v18 }
 0x3de   :  { %v652_v28 = vmul.f32 %v3130_v21, %v3401_v36 }
 0x43b   :  { %v481_v19 = vpop.permute.xlu0 %480 }
 0x43c   :  { %v483_v20 = vmul.f32 %v3128_v18, %v481_v19 }
 0x43e   :  { %485 = vrot.lane.b32.xlu0 %v483_v20, %s3270_s2 }
 0x441   :  { %v655_v23 = vpop.permute.xlu1 %654 }
 0x442   :  { %v657_v24 = vmul.f32 %v3130_v21, %v655_v23 }
 0x444   :  { %659 = vrot.lane.b32.xlu1 %v657_v24, %s3270_s2 }
 0x4b0   :  { %v486_v26 = vpop.permute.xlu0 %485 }
 0x4b1   :  { %v3491_v27 = vadd.f32 %v486_v26, %v478_v25 }
 0x4b3   :  { %3131 = vtanh.f32 %v3491_v27 }
 0x4b6   :  { %v660_v29 = vpop.permute.xlu1 %659 }
 0x4b7   :  { %v3495_v30 = vadd.f32 %v660_v29, %v652_v28 }
 0x4b9   :  { %3133 = vtanh.f32 %v3495_v30 }
 0x4bd   :  { %v3132_v31 = vpop.eup %3131 }
 0x4be   :  { %491 = vrot.lane.b32.xlu0 %v3132_v31, %s3269_s16 }
 0x4c3   :  { %v3134_v32 = vpop.eup %3133 }
 0x4c4   :  { %665 = vrot.lane.b32.xlu1 %v3134_v32, %s3269_s16 }
 0x530   :  { %v492_v33 = vpop.permute.xlu0 %491 }
 0x531   :  { %v494_v34 = vmul.f32 %v3128_v18, %v492_v33 }
 0x533   :  { %496 = vrot.lane.b32.xlu0 %v494_v34, %s3270_s2  ;;  %v175_v34 = vadd.f32 %v3452_v52, %v3396_v22 }
 0x536   :  { %v666_v35 = vpop.permute.xlu1 %665 }
 0x537   :  { %v668_v37 = vmul.f32 %v3130_v21, %v666_v35 }
 0x539   :  { %670 = vrot.lane.b32.xlu1 %v668_v37, %s3270_s2 }
 0x5a5   :  { %v497_v36 = vpop.permute.xlu0 %496 }
 0x5a6   :  { %499 = vst.msk [vmem:[#allocation3] sm:$0xff] %vm225_vm3, %v497_v36  ;;  %2737 = vmatmul.mubr.msk.f32.vlgmr.msra.gmra.mrb[4].mxu1 %vm225_vm3, %v497_v36 }
 0x5a7   :  { %2991 = vmatpush3.bf16.msra.mxu1 %v3413_v40  ;;  %2758 = vmatprep.mubr.msk.f32.mxu1 %vm3267_vm0, %v3268_v2 }
 0x5a8   :  { %2992 = vmatprep.subr.bf16.mxu1 %v3266_v1 }
 0x5ab   :  { %2994 = vmatpush3.bf16.msra.mxu1 %v3434_v46  ;;  %v671_v38 = vpop.permute.xlu1 %670 }
 0x5ac   :  { %3001 = vmatprep.subr.bf16.mxu1 %v3266_v1 }
 0x5ae   :  { %2759 = vmatmul.mubr.msk.f32.vlgmr.msra.gmra.mrb[6].mxu1 %vm225_vm3, %v671_v38 }
 0x5af   :  { %3003 = vmatpush3.bf16.msra.mxu1 %v3364_v14  ;;  %2780 = vmatprep.mubr.msk.f32.mxu1 %vm3267_vm0, %v3268_v2 }
 0x5b0   :  { %3004 = vmatprep.subr.bf16.mxu1 %v3266_v1 }
 0x5b3   :  { %3006 = vmatpush3.bf16.msra.mxu1 %v3375_v17 }
 0x5b4   :  { %3013 = vmatprep.subr.bf16.mxu1 %v3266_v1 }
 0x5b6   :  { %2781 = vmatmul.mubr.msk.f32.vlgmr.msra.gmra.mrb[8].mxu1 %vm225_vm3, %v671_v38 }
 0x5b7   :  { %3015 = vmatpush3.bf16.msra.mxu1 %v3339_v6  ;;  %2802 = vmatprep.mubr.msk.f32.mxu1 %vm3267_vm0, %v3268_v2 }
 0x5b8   :  { %3016 = vmatprep.subr.bf16.mxu1 %v3266_v1 }
 0x5bb   :  { %3018 = vmatpush3.bf16.msra.mxu1 %v3348_v10 }
 0x5bc   :  { %3025 = vmatprep.subr.bf16.mxu1 %v3266_v1 }
 0x679   :  { %v568_v39 = vpop.f32.mrb[4].mxu1 }
 0x67a   :  { %v2738_v41 = vpop.f32.mrb[5].mxu1 }
 0x681   :  { %v740_v42 = vpop.f32.mrb[6].mxu1 }
 0x682   :  { %v741_v43 = vadd.f32 %v740_v42, %v568_v39  ;;  %v2760_v44 = vpop.f32.mrb[7].mxu1 }
 0x684   :  { %v744_v45 = vadd.f32 %v3481_v59, %v741_v43 }
 0x686   :  { %3135 = vtanh.f32 %v744_v45  ;;  %v2519_v60 = vmul.f32 -1.442695, %v744_v45 }
 0x689   :  { %v915_v48 = vpop.f32.mrb[8].mxu1 }
 0x68a   :  { %v919_v49 = vadd.f32 %v915_v48, %v170_v47  ;;  %v2782_v50 = vpop.f32.mrb[9].mxu1 }
 0x68c   :  { %3137 = vtanh.f32 %v919_v49  ;;  %v2522_v61 = vmul.f32 -1.442695, %v919_v49 }
 0x68d   :  { %3139 = vpow2.f32 %v2519_v60 }
 0x68e   :  { %3141 = vpow2.f32 %v2522_v61 }
 0x690   :  { %v3136_v51 = vpop.eup %3135 }
 0x691   :  { %754 = vrot.lane.b32.xlu0 %v3136_v51, %s3269_s16 }
 0x696   :  { %v3138_v58 = vpop.eup %3137 }
 0x697   :  { %929 = vrot.lane.b32.xlu1 %v3138_v58, %s3269_s16  ;;  %v3140_v62 = vpop.eup %3139 }
 0x698   :  { %v748_v63 = vadd.f32 1.0, %v3140_v62  ;;  %v3142_v0 = vpop.eup %3141 }
 0x699   :  { %v923_v3 = vadd.f32 1.0, %v3142_v0 }
 0x69a   :  { %3143 = vrcp.f32 %v748_v63 }
 0x69b   :  { %3145 = vrcp.f32 %v923_v3 }
 0x6a4   :  { %v3144_v53 = vpop.eup %3143 }
 0x6a5   :  { %v3146_v7 = vpop.eup %3145  ;;  %v752_v11 = vmul.f32 %v3144_v53, %v3491_v27 }
 0x6a6   :  { %v927_v15 = vmul.f32 %v3146_v7, %v3495_v30 }
 0x703   :  { %v755_v4 = vpop.permute.xlu0 %754 }
 0x704   :  { %v757_v5 = vmul.f32 %v3144_v53, %v755_v4 }
 0x706   :  { %759 = vrot.lane.b32.xlu0 %v757_v5, %s3270_s2 }
 0x709   :  { %v930_v8 = vpop.permute.xlu1 %929 }
 0x70a   :  { %v932_v9 = vmul.f32 %v3146_v7, %v930_v8 }
 0x70c   :  { %934 = vrot.lane.b32.xlu1 %v932_v9, %s3270_s2 }
 0x778   :  { %v760_v12 = vpop.permute.xlu0 %759 }
 0x779   :  { %v3532_v13 = vadd.f32 %v760_v12, %v752_v11 }
 0x77b   :  { %3147 = vtanh.f32 %v3532_v13 }
 0x77e   :  { %v935_v16 = vpop.permute.xlu1 %934 }
 0x77f   :  { %v3536_v18 = vadd.f32 %v935_v16, %v927_v15 }
 0x781   :  { %3149 = vtanh.f32 %v3536_v18 }
 0x785   :  { %v3148_v19 = vpop.eup %3147 }
 0x786   :  { %765 = vrot.lane.b32.xlu0 %v3148_v19, %s3269_s16 }
 0x78b   :  { %v3150_v20 = vpop.eup %3149 }
 0x78c   :  { %940 = vrot.lane.b32.xlu1 %v3150_v20, %s3269_s16 }
 0x7f8   :  { %v766_v21 = vpop.permute.xlu0 %765 }
 0x7f9   :  { %v768_v23 = vmul.f32 %v3144_v53, %v766_v21  ;;  %v180_v21 = vadd.f32 %v3396_v22, %v3458_v55 }
 0x7fb   :  { %770 = vrot.lane.b32.xlu0 %v768_v23, %s3270_s2 }
 0x7fe   :  { %v941_v24 = vpop.permute.xlu1 %940 }
 0x7ff   :  { %v943_v25 = vmul.f32 %v3146_v7, %v941_v24 }
 0x801   :  { %945 = vrot.lane.b32.xlu1 %v943_v25, %s3270_s2 }
 0x86d   :  { %v771_v26 = vpop.permute.xlu0 %770 }
 0x86e   :  { %774 = vst.msk [vmem:[#allocation3 + $0x8] sm:$0xff] %vm225_vm3, %v771_v26  ;;  %2770 = vmatmul.mubr.msk.f32.vlgmr.msra.gmra.mrb[12].mxu0 %vm225_vm3, %v771_v26 }
 0x86f   :  { %3009 = vmatpush3.bf16.msra.mxu0 %v3413_v40  ;;  %2791 = vmatprep.mubr.msk.f32.mxu0 %vm3267_vm0, %v3268_v2 }
 0x870   :  { %3010 = vmatprep.subr.bf16.mxu0 %v3266_v1 }
 0x873   :  { %3012 = vmatpush3.bf16.msra.mxu0 %v3434_v46  ;;  %v946_v27 = vpop.permute.xlu1 %945 }
 0x874   :  { %3019 = vmatprep.subr.bf16.mxu0 %v3266_v1 }
 0x876   :  { %2792 = vmatmul.mubr.msk.f32.vlgmr.msra.gmra.mrb[14].mxu0 %vm225_vm3, %v946_v27 }
 0x877   :  { %3021 = vmatpush3.bf16.msra.mxu0 %v3364_v14  ;;  %2813 = vmatprep.mubr.msk.f32.mxu0 %vm3267_vm0, %v3268_v2 }
 0x878   :  { %3022 = vmatprep.subr.bf16.mxu0 %v3266_v1 }
 0x87b   :  { %3024 = vmatpush3.bf16.msra.mxu0 %v3375_v17 }
 0x87c   :  { %3031 = vmatprep.subr.bf16.mxu0 %v3266_v1 }
 0x87e   :  { %2814 = vmatmul.mubr.msk.f32.vlgmr.msra.gmra.mrb[16].mxu0 %vm225_vm3, %v946_v27 }
 0x87f   :  { %3033 = vmatpush3.bf16.msra.mxu0 %v3339_v6  ;;  %2835 = vmatprep.mubr.msk.f32.mxu0 %vm3267_vm0, %v3268_v2 }
 0x880   :  { %3034 = vmatprep.subr.bf16.mxu0 %v3266_v1 }
 0x883   :  { %3036 = vmatpush3.bf16.msra.mxu0 %v3348_v10 }
 0x884   :  { %3043 = vmatprep.subr.bf16.mxu0 %v3266_v1 }
 0x941   :  { %v843_v28 = vpop.f32.mrb[12].mxu0 }
 0x942   :  { %v2771_v29 = vpop.f32.mrb[13].mxu0 }
 0x949   :  { %v1015_v30 = vpop.f32.mrb[14].mxu0 }
 0x94a   :  { %v1016_v31 = vadd.f32 %v1015_v30, %v843_v28  ;;  %v2793_v32 = vpop.f32.mrb[15].mxu0 }
 0x94c   :  { %v1019_v33 = vadd.f32 %v3481_v59, %v1016_v31 }
 0x94e   :  { %3151 = vtanh.f32 %v1019_v33  ;;  %v2524_v41 = vmul.f32 -1.442695, %v1019_v33 }
 0x951   :  { %v1190_v35 = vpop.f32.mrb[16].mxu0 }
 0x952   :  { %v1194_v37 = vadd.f32 %v1190_v35, %v175_v34  ;;  %v2815_v36 = vpop.f32.mrb[17].mxu0 }
 0x954   :  { %3153 = vtanh.f32 %v1194_v37  ;;  %v2527_v42 = vmul.f32 -1.442695, %v1194_v37 }
 0x955   :  { %3155 = vpow2.f32 %v2524_v41 }
 0x956   :  { %3157 = vpow2.f32 %v2527_v42 }
 0x958   :  { %v3152_v38 = vpop.eup %3151 }
 0x959   :  { %1029 = vrot.lane.b32.xlu0 %v3152_v38, %s3269_s16 }
 0x95e   :  { %v3154_v39 = vpop.eup %3153 }
 0x95f   :  { %1204 = vrot.lane.b32.xlu1 %v3154_v39, %s3269_s16  ;;  %v3156_v43 = vpop.eup %3155 }
 0x960   :  { %v1023_v44 = vadd.f32 1.0, %v3156_v43  ;;  %v3158_v45 = vpop.eup %3157 }
 0x961   :  { %v1198_v47 = vadd.f32 1.0, %v3158_v45 }
 0x962   :  { %3159 = vrcp.f32 %v1023_v44 }
 0x963   :  { %3161 = vrcp.f32 %v1198_v47 }
 0x96c   :  { %v3160_v52 = vpop.eup %3159 }
 0x96d   :  { %v3162_v50 = vpop.eup %3161  ;;  %v1027_v60 = vmul.f32 %v3160_v52, %v3532_v13 }
 0x96e   :  { %v1202_v63 = vmul.f32 %v3162_v50, %v3536_v18 }
 0x9cb   :  { %v1030_v48 = vpop.permute.xlu0 %1029 }
 0x9cc   :  { %v1032_v49 = vmul.f32 %v3160_v52, %v1030_v48 }
 0x9ce   :  { %1034 = vrot.lane.b32.xlu0 %v1032_v49, %s3270_s2 }
 0x9d1   :  { %v1205_v51 = vpop.permute.xlu1 %1204 }
 0x9d2   :  { %v1207_v58 = vmul.f32 %v3162_v50, %v1205_v51 }
 0x9d4   :  { %1209 = vrot.lane.b32.xlu1 %v1207_v58, %s3270_s2 }
 0xa40   :  { %v1035_v61 = vpop.permute.xlu0 %1034 }
 0xa41   :  { %v3573_v62 = vadd.f32 %v1035_v61, %v1027_v60 }
 0xa43   :  { %3163 = vtanh.f32 %v3573_v62 }
 0xa46   :  { %v1210_v0 = vpop.permute.xlu1 %1209 }
 0xa47   :  { %v3577_v3 = vadd.f32 %v1210_v0, %v1202_v63 }
 0xa49   :  { %3165 = vtanh.f32 %v3577_v3 }
 0xa4d   :  { %v3164_v53 = vpop.eup %3163 }
 0xa4e   :  { %1040 = vrot.lane.b32.xlu0 %v3164_v53, %s3269_s16 }
 0xa53   :  { %v3166_v4 = vpop.eup %3165 }
 0xa54   :  { %1215 = vrot.lane.b32.xlu1 %v3166_v4, %s3269_s16  ;;  %v185_v4 = vadd.f32 %v3456_v54, %v3396_v22 }
 0xac0   :  { %v1041_v5 = vpop.permute.xlu0 %1040 }
 0xac1   :  { %v1043_v7 = vmul.f32 %v3160_v52, %v1041_v5 }
 0xac3   :  { %1045 = vrot.lane.b32.xlu0 %v1043_v7, %s3270_s2 }
 0xac6   :  { %v1216_v8 = vpop.permute.xlu1 %1215 }
 0xac7   :  { %v1218_v9 = vmul.f32 %v3162_v50, %v1216_v8 }
 0xac9   :  { %1220 = vrot.lane.b32.xlu1 %v1218_v9, %s3270_s2 }
 0xb35   :  { %v1046_v11 = vpop.permute.xlu0 %1045 }
 0xb36   :  { %1049 = vst.msk [vmem:[#allocation3 + $0x10] sm:$0xff] %vm225_vm3, %v1046_v11  ;;  %2803 = vmatmul.mubr.msk.f32.vlgmr.msra.gmra.mrb[10].mxu1 %vm225_vm3, %v1046_v11 }
 0xb37   :  { %3027 = vmatpush3.bf16.msra.mxu1 %v3413_v40  ;;  %2824 = vmatprep.mubr.msk.f32.mxu1 %vm3267_vm0, %v3268_v2 }
 0xb38   :  { %3028 = vmatprep.subr.bf16.mxu1 %v3266_v1 }
 0xb3b   :  { %3030 = vmatpush3.bf16.msra.mxu1 %v3434_v46  ;;  %v1221_v12 = vpop.permute.xlu1 %1220 }
 0xb3c   :  { %3037 = vmatprep.subr.bf16.mxu1 %v3266_v1 }
 0xb3e   :  { %2825 = vmatmul.mubr.msk.f32.vlgmr.msra.gmra.mrb[12].mxu1 %vm225_vm3, %v1221_v12 }
 0xb3f   :  { %3039 = vmatpush3.bf16.msra.mxu1 %v3364_v14  ;;  %2846 = vmatprep.mubr.msk.f32.mxu1 %vm3267_vm0, %v3268_v2 }
 0xb40   :  { %3040 = vmatprep.subr.bf16.mxu1 %v3266_v1 }
 0xb43   :  { %3042 = vmatpush3.bf16.msra.mxu1 %v3375_v17 }
 0xb44   :  { %3049 = vmatprep.subr.bf16.mxu1 %v3266_v1 }
 0xb46   :  { %2847 = vmatmul.mubr.msk.f32.vlgmr.msra.gmra.mrb[14].mxu1 %vm225_vm3, %v1221_v12 }
 0xb47   :  { %3051 = vmatpush3.bf16.msra.mxu1 %v3339_v6  ;;  %2868 = vmatprep.mubr.msk.f32.mxu1 %vm3267_vm0, %v3268_v2 }
 0xb48   :  { %3052 = vmatprep.subr.bf16.mxu1 %v3266_v1 }
 0xb4b   :  { %3054 = vmatpush3.bf16.msra.mxu1 %v3348_v10 }
 0xb4c   :  { %3061 = vmatprep.subr.bf16.mxu1 %v3266_v1 }
 0xc09   :  { %v1118_v13 = vpop.f32.mrb[10].mxu1 }
 0xc0a   :  { %v2804_v15 = vpop.f32.mrb[11].mxu1 }
 0xc11   :  { %v1290_v16 = vpop.f32.mrb[12].mxu1 }
 0xc12   :  { %v1291_v18 = vadd.f32 %v1290_v16, %v1118_v13  ;;  %v2826_v19 = vpop.f32.mrb[13].mxu1 }
 0xc14   :  { %v1294_v20 = vadd.f32 %v3481_v59, %v1291_v18 }
 0xc16   :  { %3167 = vtanh.f32 %v1294_v20  ;;  %v2529_v28 = vmul.f32 -1.442695, %v1294_v20 }
 0xc19   :  { %v1465_v23 = vpop.f32.mrb[14].mxu1 }
 0xc1a   :  { %v1469_v24 = vadd.f32 %v1465_v23, %v180_v21  ;;  %v2848_v25 = vpop.f32.mrb[15].mxu1 }
 0xc1c   :  { %3169 = vtanh.f32 %v1469_v24  ;;  %v2532_v29 = vmul.f32 -1.442695, %v1469_v24 }
 0xc1d   :  { %3171 = vpow2.f32 %v2529_v28 }
 0xc1e   :  { %3173 = vpow2.f32 %v2532_v29 }
 0xc20   :  { %v3168_v26 = vpop.eup %3167 }
 0xc21   :  { %1304 = vrot.lane.b32.xlu0 %v3168_v26, %s3269_s16 }
 0xc26   :  { %v3170_v27 = vpop.eup %3169 }
 0xc27   :  { %1479 = vrot.lane.b32.xlu1 %v3170_v27, %s3269_s16  ;;  %v3172_v30 = vpop.eup %3171 }
 0xc28   :  { %v1298_v31 = vadd.f32 1.0, %v3172_v30  ;;  %v3174_v32 = vpop.eup %3173 }
 0xc29   :  { %v1473_v33 = vadd.f32 1.0, %v3174_v32 }
 0xc2a   :  { %3175 = vrcp.f32 %v1298_v31 }
 0xc2b   :  { %3177 = vrcp.f32 %v1473_v33 }
 0xc34   :  { %v3176_v55 = vpop.eup %3175 }
 0xc35   :  { %v3178_v37 = vpop.eup %3177  ;;  %v1302_v39 = vmul.f32 %v3176_v55, %v3573_v62 }
 0xc36   :  { %v1477_v43 = vmul.f32 %v3178_v37, %v3577_v3 }
 0xc93   :  { %v1305_v34 = vpop.permute.xlu0 %1304 }
 0xc94   :  { %v1307_v35 = vmul.f32 %v3176_v55, %v1305_v34 }
 0xc96   :  { %1309 = vrot.lane.b32.xlu0 %v1307_v35, %s3270_s2 }
 0xc99   :  { %v1480_v36 = vpop.permute.xlu1 %1479 }
 0xc9a   :  { %v1482_v38 = vmul.f32 %v3178_v37, %v1480_v36 }
 0xc9c   :  { %1484 = vrot.lane.b32.xlu1 %v1482_v38, %s3270_s2 }
 0xd08   :  { %v1310_v41 = vpop.permute.xlu0 %1309 }
 0xd09   :  { %v3614_v42 = vadd.f32 %v1310_v41, %v1302_v39 }
 0xd0b   :  { %3179 = vtanh.f32 %v3614_v42 }
 0xd0e   :  { %v1485_v44 = vpop.permute.xlu1 %1484 }
 0xd0f   :  { %v3618_v45 = vadd.f32 %v1485_v44, %v1477_v43 }
 0xd11   :  { %3181 = vtanh.f32 %v3618_v45 }
 0xd15   :  { %v3180_v47 = vpop.eup %3179 }
 0xd16   :  { %1315 = vrot.lane.b32.xlu0 %v3180_v47, %s3269_s16 }
 0xd1b   :  { %v3182_v52 = vpop.eup %3181 }
 0xd1c   :  { %1490 = vrot.lane.b32.xlu1 %v3182_v52, %s3269_s16 }
 0xd88   :  { %v1316_v48 = vpop.permute.xlu0 %1315 }
 0xd89   :  { %v1318_v49 = vmul.f32 %v3176_v55, %v1316_v48 }
 0xd8b   :  { %1320 = vrot.lane.b32.xlu0 %v1318_v49, %s3270_s2 }
 0xd8e   :  { %v1491_v50 = vpop.permute.xlu1 %1490 }
 0xd8f   :  { %v1493_v51 = vmul.f32 %v3178_v37, %v1491_v50 }
 0xd91   :  { %1495 = vrot.lane.b32.xlu1 %v1493_v51, %s3270_s2 }
 0xdfd   :  { %v1321_v58 = vpop.permute.xlu0 %1320 }
 0xdfe   :  { %1324 = vst.msk [vmem:[#allocation3 + $0x18] sm:$0xff] %vm225_vm3, %v1321_v58  ;;  %2836 = vmatmul.mubr.msk.f32.vlgmr.msra.gmra.mrb[18].mxu0 %vm225_vm3, %v1321_v58 }
 0xdff   :  { %3045 = vmatpush3.bf16.msra.mxu0 %v3413_v40  ;;  %2857 = vmatprep.mubr.msk.f32.mxu0 %vm3267_vm0, %v3268_v2 }
 0xe00   :  { %3046 = vmatprep.subr.bf16.mxu0 %v3266_v1 }
 0xe03   :  { %3048 = vmatpush3.bf16.msra.mxu0 %v3434_v46  ;;  %v1496_v60 = vpop.permute.xlu1 %1495 }
 0xe04   :  { %3055 = vmatprep.subr.bf16.mxu0 %v3266_v1 }
 0xe06   :  { %2858 = vmatmul.mubr.msk.f32.vlgmr.msra.gmra.mrb[20].mxu0 %vm225_vm3, %v1496_v60 }
 0xe07   :  { %3057 = vmatpush3.bf16.msra.mxu0 %v3364_v14  ;;  %2879 = vmatprep.mubr.msk.f32.mxu0 %vm3267_vm0, %v3268_v2 }
 0xe08   :  { %3058 = vmatprep.subr.bf16.mxu0 %v3266_v1 }
 0xe0b   :  { %3060 = vmatpush3.bf16.msra.mxu0 %v3375_v17 }
 0xe0c   :  { %3067 = vmatprep.subr.bf16.mxu0 %v3266_v1 }
 0xe0e   :  { %2880 = vmatmul.mubr.msk.f32.vlgmr.msra.gmra.mrb[22].mxu0 %vm225_vm3, %v1496_v60 }
 0xe0f   :  { %3069 = vmatpush3.bf16.msra.mxu0 %v3339_v6  ;;  %2901 = vmatprep.mubr.msk.f32.mxu0 %vm3267_vm0, %v3268_v2 }
 0xe10   :  { %3070 = vmatprep.subr.bf16.mxu0 %v3266_v1 }
 0xe13   :  { %3072 = vmatpush3.bf16.msra.mxu0 %v3348_v10 }
 0xe14   :  { %3079 = vmatprep.subr.bf16.mxu0 %v3266_v1 }
 0xed1   :  { %v1393_v61 = vpop.f32.mrb[18].mxu0 }
 0xed2   :  { %v2837_v62 = vpop.f32.mrb[19].mxu0 }
 0xed9   :  { %v1565_v63 = vpop.f32.mrb[20].mxu0 }
 0xeda   :  { %v1566_v0 = vadd.f32 %v1565_v63, %v1393_v61  ;;  %v2859_v3 = vpop.f32.mrb[21].mxu0 }
 0xedc   :  { %v1569_v53 = vadd.f32 %v3481_v59, %v1566_v0 }
 0xede   :  { %3183 = vtanh.f32 %v1569_v53  ;;  %v2534_v12 = vmul.f32 -1.442695, %v1569_v53 }
 0xee1   :  { %v1740_v5 = vpop.f32.mrb[22].mxu0 }
 0xee2   :  { %v1744_v7 = vadd.f32 %v1740_v5, %v185_v4  ;;  %v2881_v8 = vpop.f32.mrb[23].mxu0 }
 0xee4   :  { %3185 = vtanh.f32 %v1744_v7  ;;  %v2537_v13 = vmul.f32 -1.442695, %v1744_v7 }
 0xee5   :  { %3187 = vpow2.f32 %v2534_v12 }
 0xee6   :  { %3189 = vpow2.f32 %v2537_v13 }
 0xee8   :  { %v3184_v9 = vpop.eup %3183 }
 0xee9   :  { %1579 = vrot.lane.b32.xlu0 %v3184_v9, %s3269_s16 }
 0xeee   :  { %v3186_v11 = vpop.eup %3185 }
 0xeef   :  { %1754 = vrot.lane.b32.xlu1 %v3186_v11, %s3269_s16  ;;  %v3188_v15 = vpop.eup %3187 }
 0xef0   :  { %v1573_v16 = vadd.f32 1.0, %v3188_v15  ;;  %v3190_v18 = vpop.eup %3189 }
 0xef1   :  { %v1748_v19 = vadd.f32 1.0, %v3190_v18 }
 0xef2   :  { %3191 = vrcp.f32 %v1573_v16 }
 0xef3   :  { %3193 = vrcp.f32 %v1748_v19 }
 0xefc   :  { %v3192_v54 = vpop.eup %3191 }
 0xefd   :  { %v3194_v23 = vpop.eup %3193  ;;  %v1577_v26 = vmul.f32 %v3192_v54, %v3614_v42 }
 0xefe   :  { %v1752_v29 = vmul.f32 %v3194_v23, %v3618_v45 }
 0xf5b   :  { %v1580_v20 = vpop.permute.xlu0 %1579 }
 0xf5c   :  { %v1582_v21 = vmul.f32 %v3192_v54, %v1580_v20 }
 0xf5e   :  { %1584 = vrot.lane.b32.xlu0 %v1582_v21, %s3270_s2 }
 0xf61   :  { %v1755_v24 = vpop.permute.xlu1 %1754 }
 0xf62   :  { %v1757_v25 = vmul.f32 %v3194_v23, %v1755_v24 }
 0xf64   :  { %1759 = vrot.lane.b32.xlu1 %v1757_v25, %s3270_s2 }
 0xfd0   :  { %v1585_v27 = vpop.permute.xlu0 %1584 }
 0xfd1   :  { %v3655_v28 = vadd.f32 %v1585_v27, %v1577_v26 }
 0xfd3   :  { %3195 = vtanh.f32 %v3655_v28 }
 0xfd6   :  { %v1760_v30 = vpop.permute.xlu1 %1759 }
 0xfd7   :  { %v3659_v31 = vadd.f32 %v1760_v30, %v1752_v29 }
 0xfd9   :  { %3197 = vtanh.f32 %v3659_v31 }
 0xfdd   :  { %v3196_v32 = vpop.eup %3195 }
 0xfde   :  { %1590 = vrot.lane.b32.xlu0 %v3196_v32, %s3269_s16 }
 0xfe3   :  { %v3198_v33 = vpop.eup %3197 }
 0xfe4   :  { %1765 = vrot.lane.b32.xlu1 %v3198_v33, %s3269_s16 }
0x1050   :  { %v1591_v55 = vpop.permute.xlu0 %1590 }
0x1051   :  { %v1593_v34 = vmul.f32 %v3192_v54, %v1591_v55 }
0x1053   :  { %1595 = vrot.lane.b32.xlu0 %v1593_v34, %s3270_s2 }
0x1056   :  { %v1766_v35 = vpop.permute.xlu1 %1765 }
0x1057   :  { %v1768_v37 = vmul.f32 %v3194_v23, %v1766_v35 }
0x1059   :  { %1770 = vrot.lane.b32.xlu1 %v1768_v37, %s3270_s2 }
0x10c5   :  { %v1596_v36 = vpop.permute.xlu0 %1595 }
0x10c6   :  { %1599 = vst.msk [vmem:[#allocation3 + $0x20] sm:$0xff] %vm225_vm3, %v1596_v36  ;;  %2869 = vmatmul.mubr.msk.f32.vlgmr.msra.gmra.mrb[16].mxu1 %vm225_vm3, %v1596_v36 }
0x10c7   :  { %3063 = vmatpush3.bf16.msra.mxu1 %v3413_v40  ;;  %2890 = vmatprep.mubr.msk.f32.mxu1 %vm3267_vm0, %v3268_v2 }
0x10c8   :  { %3064 = vmatprep.subr.bf16.mxu1 %v3266_v1 }
0x10cb   :  { %3066 = vmatpush3.bf16.msra.mxu1 %v3434_v46  ;;  %v1771_v38 = vpop.permute.xlu1 %1770 }
0x10cc   :  { %3073 = vmatprep.subr.bf16.mxu1 %v3266_v1 }
0x10ce   :  { %2891 = vmatmul.mubr.msk.f32.vlgmr.msra.gmra.mrb[18].mxu1 %vm225_vm3, %v1771_v38 }
0x10cf   :  { %3075 = vmatpush3.bf16.msra.mxu1 %v3364_v14  ;;  %2912 = vmatprep.mubr.msk.f32.mxu1 %vm3267_vm0, %v3268_v2 }
0x10d0   :  { %3076 = vmatprep.subr.bf16.mxu1 %v3266_v1 }
0x10d3   :  { %3078 = vmatpush3.bf16.msra.mxu1 %v3375_v17 }
0x10d4   :  { %3085 = vmatprep.subr.bf16.mxu1 %v3266_v1 }
0x10d6   :  { %2913 = vmatmul.mubr.msk.f32.vlgmr.msra.gmra.mrb[20].mxu1 %vm225_vm3, %v1771_v38 }
0x10d7   :  { %3087 = vmatpush3.bf16.msra.mxu1 %v3339_v6  ;;  %2934 = vmatprep.mubr.msk.f32.mxu1 %vm3267_vm0, %v3268_v2  ;;  %v190_v6 = vadd.f32 %v3396_v22, %v3462_v57 }
0x10d8   :  { %3088 = vmatprep.subr.bf16.mxu1 %v3266_v1 }
0x10db   :  { %3090 = vmatpush3.bf16.msra.mxu1 %v3348_v10 }
0x10dc   :  { %3097 = vmatprep.subr.bf16.mxu1 %v3266_v1 }
0x1199   :  { %v1668_v39 = vpop.f32.mrb[16].mxu1 }
0x119a   :  { %v2870_v41 = vpop.f32.mrb[17].mxu1 }
0x11a1   :  { %v1840_v42 = vpop.f32.mrb[18].mxu1 }
0x11a2   :  { %v1841_v43 = vadd.f32 %v1840_v42, %v1668_v39  ;;  %v2892_v44 = vpop.f32.mrb[19].mxu1 }
0x11a4   :  { %v1844_v45 = vadd.f32 %v3481_v59, %v1841_v43 }
0x11a6   :  { %3199 = vtanh.f32 %v1844_v45  ;;  %v2539_v50 = vmul.f32 -1.442695, %v1844_v45 }
0x11a9   :  { %v2015_v47 = vpop.f32.mrb[20].mxu1 }
0x11aa   :  { %v2019_v52 = vadd.f32 %v2015_v47, %v190_v6  ;;  %v2914_v48 = vpop.f32.mrb[21].mxu1 }
0x11ac   :  { %3201 = vtanh.f32 %v2019_v52  ;;  %v2542_v51 = vmul.f32 -1.442695, %v2019_v52 }
0x11ad   :  { %3203 = vpow2.f32 %v2539_v50 }
0x11ae   :  { %3205 = vpow2.f32 %v2542_v51 }
0x11b0   :  { %v3200_v49 = vpop.eup %3199 }
0x11b1   :  { %1854 = vrot.lane.b32.xlu0 %v3200_v49, %s3269_s16 }
0x11b6   :  { %v3202_v10 = vpop.eup %3201 }
0x11b7   :  { %2029 = vrot.lane.b32.xlu1 %v3202_v10, %s3269_s16  ;;  %v3204_v58 = vpop.eup %3203 }
0x11b8   :  { %v1848_v60 = vadd.f32 1.0, %v3204_v58  ;;  %v3206_v61 = vpop.eup %3205 }
0x11b9   :  { %v2023_v62 = vadd.f32 1.0, %v3206_v61 }
0x11ba   :  { %3207 = vrcp.f32 %v1848_v60 }
0x11bb   :  { %3209 = vrcp.f32 %v2023_v62 }
0x11c4   :  { %v3208_v57 = vpop.eup %3207 }
0x11c5   :  { %v3210_v3 = vpop.eup %3209  ;;  %v1852_v5 = vmul.f32 %v3208_v57, %v3655_v28 }
0x11c6   :  { %v2027_v9 = vmul.f32 %v3210_v3, %v3659_v31 }
0x1223   :  { %v1855_v63 = vpop.permute.xlu0 %1854 }
0x1224   :  { %v1857_v0 = vmul.f32 %v3208_v57, %v1855_v63 }
0x1226   :  { %1859 = vrot.lane.b32.xlu0 %v1857_v0, %s3270_s2 }
0x1229   :  { %v2030_v53 = vpop.permute.xlu1 %2029 }
0x122a   :  { %v2032_v4 = vmul.f32 %v3210_v3, %v2030_v53 }
0x122c   :  { %2034 = vrot.lane.b32.xlu1 %v2032_v4, %s3270_s2 }
0x1298   :  { %v1860_v7 = vpop.permute.xlu0 %1859 }
0x1299   :  { %v3696_v8 = vadd.f32 %v1860_v7, %v1852_v5 }
0x129b   :  { %3211 = vtanh.f32 %v3696_v8 }
0x129e   :  { %v2035_v11 = vpop.permute.xlu1 %2034 }
0x129f   :  { %v3700_v12 = vadd.f32 %v2035_v11, %v2027_v9 }
0x12a1   :  { %3213 = vtanh.f32 %v3700_v12 }
0x12a5   :  { %v3212_v13 = vpop.eup %3211 }
0x12a6   :  { %1865 = vrot.lane.b32.xlu0 %v3212_v13, %s3269_s16  ;;  %v2550_v13 = vld [vmem:[%s3799_s7] ss:$0 sm:$0xff] }
0x12ab   :  { %v3214_v15 = vpop.eup %3213 }
0x12ac   :  { %2040 = vrot.lane.b32.xlu1 %v3214_v15, %s3269_s16 }
0x1318   :  { %v1866_v16 = vpop.permute.xlu0 %1865 }
0x1319   :  { %v1868_v18 = vmul.f32 %v3208_v57, %v1866_v16  ;;  %v2427_v16 = vld [vmem:[#allocation3 + $0x10] sm:$0xff] }
0x131b   :  { %1870 = vrot.lane.b32.xlu0 %v1868_v18, %s3270_s2 }
0x131e   :  { %v2041_v19 = vpop.permute.xlu1 %2040 }
0x131f   :  { %v2043_v54 = vmul.f32 %v3210_v3, %v2041_v19  ;;  %v2442_v19 = vmul.f32 %v2550_v13, %v2427_v16 }
0x1321   :  { %2045 = vrot.lane.b32.xlu1 %v2043_v54, %s3270_s2  ;;  %v2428_v54 = vld [vmem:[#allocation3 + $0x18] sm:$0xff] }
0x138d   :  { %v1871_v20 = vpop.permute.xlu0 %1870 }
0x138e   :  { %1874 = vst.msk [vmem:[#allocation3 + $0x28] sm:$0xff] %vm225_vm3, %v1871_v20  ;;  %2902 = vmatmul.mubr.msk.f32.vlgmr.msra.gmra.mrb[24].mxu0 %vm225_vm3, %v1871_v20  ;;  %v2454_v20 = vsel %vm225_vm3, %v2442_v19, 0.0 }
0x138f   :  { %3081 = vmatpush3.bf16.msra.mxu0 %v3413_v40  ;;  %2923 = vmatprep.mubr.msk.f32.mxu0 %vm3267_vm0, %v3268_v2 }
0x1390   :  { %3082 = vmatprep.subr.bf16.mxu0 %v3266_v1 }
0x1393   :  { %3084 = vmatpush3.bf16.msra.mxu0 %v3434_v46  ;;  %v2046_v21 = vpop.permute.xlu1 %2045 }
0x1394   :  { %3091 = vmatprep.subr.bf16.mxu0 %v3266_v1 }
0x1396   :  { %2924 = vmatmul.mubr.msk.f32.vlgmr.msra.gmra.mrb[26].mxu0 %vm225_vm3, %v2046_v21 }
0x1397   :  { %3093 = vmatpush3.bf16.msra.mxu0 %v3364_v14  ;;  %2945 = vmatprep.mubr.msk.f32.mxu0 %vm3267_vm0, %v3268_v2  ;;  %v195_v14 = vadd.f32 %v3460_v56, %v3396_v22 }
0x1398   :  { %3094 = vmatprep.subr.bf16.mxu0 %v3266_v1 }
0x139b   :  { %3096 = vmatpush3.bf16.msra.mxu0 %v3375_v17 }
0x139e   :  { %2946 = vmatmul.mubr.msk.f32.vlgmr.msra.gmra.mrb[28].mxu0 %vm225_vm3, %v2046_v21  ;;  %v2443_v21 = vmul.f32 %v2550_v13, %v2428_v54 }
0x1461   :  { %v1943_v23 = vpop.f32.mrb[24].mxu0 }
0x1462   :  { %v2903_v24 = vpop.f32.mrb[25].mxu0 }
0x1463   :  { %v2457_v24 = vsel %vm225_vm3, %v2443_v21, 0.0 }
0x1469   :  { %v2115_v25 = vpop.f32.mrb[26].mxu0 }
0x146a   :  { %v2116_v26 = vadd.f32 %v2115_v25, %v1943_v23  ;;  %v2925_v27 = vpop.f32.mrb[27].mxu0  ;;  %v2430_v23 = vld [vmem:[#allocation3 + $0x28] sm:$0xff] }
0x146b   :  { %v2445_v25 = vmul.f32 %v2550_v13, %v2430_v23 }
0x146c   :  { %v2119_v28 = vadd.f32 %v3481_v59, %v2116_v26 }
0x146d   :  { %v2463_v26 = vsel %vm225_vm3, %v2445_v25, 0.0 }
0x146e   :  { %3215 = vtanh.f32 %v2119_v28  ;;  %v2544_v33 = vmul.f32 -1.442695, %v2119_v28 }
0x1471   :  { %v2290_v29 = vpop.f32.mrb[28].mxu0 }
0x1472   :  { %v2294_v30 = vadd.f32 %v2290_v29, %v195_v14  ;;  %v2947_v31 = vpop.f32.mrb[29].mxu0  ;;  %v2426_v14 = vld [vmem:[#allocation3 + $0x8] sm:$0xff] }
0x1473   :  { %v2441_v29 = vmul.f32 %v2550_v13, %v2426_v14 }
0x1474   :  { %3217 = vtanh.f32 %v2294_v30  ;;  %v2547_v55 = vmul.f32 -1.442695, %v2294_v30  ;;  %v2429_v30 = vld [vmem:[#allocation3 + $0x20] sm:$0xff] }
0x1475   :  { %3219 = vpow2.f32 %v2544_v33  ;;  %v2451_v31 = vsel %vm225_vm3, %v2441_v29, 0.0 }
0x1476   :  { %3221 = vpow2.f32 %v2547_v55 }
0x1478   :  { %v3216_v32 = vpop.eup %3215 }
0x1479   :  { %2129 = vrot.lane.b32.xlu0 %v3216_v32, %s3269_s16  ;;  %v2444_v32 = vmul.f32 %v2550_v13, %v2429_v30 }
0x147b   :  { %v2460_v33 = vsel %vm225_vm3, %v2444_v32, 0.0 }
0x147e   :  { %v3218_v17 = vpop.eup %3217 }
0x147f   :  { %2304 = vrot.lane.b32.xlu1 %v3218_v17, %s3269_s16  ;;  %v3220_v34 = vpop.eup %3219 }
0x1480   :  { %v2123_v35 = vadd.f32 1.0, %v3220_v34  ;;  %v3222_v37 = vpop.eup %3221 }
0x1481   :  { %v2298_v36 = vadd.f32 1.0, %v3222_v37 }
0x1482   :  { %3223 = vrcp.f32 %v2123_v35  ;;  %v2551_v35 = vld [vmem:[#allocation4] ss:$0 sm:$0xff] }
0x1483   :  { %3225 = vrcp.f32 %v2298_v36 }
0x148c   :  { %v3224_v22 = vpop.eup %3223 }
0x148d   :  { %v3226_v39 = vpop.eup %3225  ;;  %v2127_v43 = vmul.f32 %v3224_v22, %v3696_v8 }
0x148e   :  { %v2302_v6 = vmul.f32 %v3226_v39, %v3700_v12 }
0x14eb   :  { %v2130_v56 = vpop.permute.xlu0 %2129 }
0x14ec   :  { %v2132_v38 = vmul.f32 %v3224_v22, %v2130_v56 }
0x14ee   :  { %2134 = vrot.lane.b32.xlu0 %v2132_v38, %s3270_s2 }
0x14f1   :  { %v2305_v41 = vpop.permute.xlu1 %2304 }
0x14f2   :  { %v2307_v42 = vmul.f32 %v3226_v39, %v2305_v41 }
0x14f4   :  { %2309 = vrot.lane.b32.xlu1 %v2307_v42, %s3270_s2 }
0x1560   :  { %v2135_v44 = vpop.permute.xlu0 %2134 }
0x1561   :  { %v2137_v45 = vadd.f32 %v2135_v44, %v2127_v43 }
0x1563   :  { %3227 = vtanh.f32 %v2137_v45 }
0x1566   :  { %v2310_v47 = vpop.permute.xlu1 %2309 }
0x1567   :  { %v2312_v52 = vadd.f32 %v2310_v47, %v2302_v6 }
0x1569   :  { %3229 = vtanh.f32 %v2312_v52 }
0x156d   :  { %v3228_v48 = vpop.eup %3227 }
0x156e   :  { %2140 = vrot.lane.b32.xlu0 %v3228_v48, %s3269_s16 }
0x1573   :  { %v3230_v49 = vpop.eup %3229 }
0x1574   :  { %2315 = vrot.lane.b32.xlu1 %v3230_v49, %s3269_s16 }
0x15e0   :  { %v2141_v10 = vpop.permute.xlu0 %2140 }
0x15e1   :  { %v2143_v50 = vmul.f32 %v3224_v22, %v2141_v10 }
0x15e3   :  { %2145 = vrot.lane.b32.xlu0 %v2143_v50, %s3270_s2 }
0x15e6   :  { %v2316_v51 = vpop.permute.xlu1 %2315 }
0x15e7   :  { %v2318_v58 = vmul.f32 %v3226_v39, %v2316_v51 }
0x15e9   :  { %2320 = vrot.lane.b32.xlu1 %v2318_v58, %s3270_s2 }
0x1655   :  { %v2146_v60 = vpop.permute.xlu0 %2145 }
0x1656   :  { %2149 = vst.msk [vmem:[#allocation3 + $0x30] sm:$0xff] %vm225_vm3, %v2146_v60  ;;  %2935 = vmatmul.mubr.msk.f32.vlgmr.msra.gmra.mrb[22].mxu1 %vm225_vm3, %v2146_v60 }
0x1657   :  { %3099 = vmatpush3.bf16.msra.mxu1 %v3413_v40  ;;  %2956 = vmatprep.mubr.msk.f32.mxu1 %vm3267_vm0, %v3268_v2 }
0x1658   :  { %3100 = vmatprep.subr.bf16.mxu1 %v3266_v1 }
0x165b   :  { %3102 = vmatpush3.bf16.msra.mxu1 %v3434_v46  ;;  %v2321_v61 = vpop.permute.xlu1 %2320 }
0x165d   :  { %v2431_v17 = vld [vmem:[#allocation3 + $0x30] sm:$0xff] }
0x165e   :  { %2957 = vmatmul.mubr.msk.f32.vlgmr.msra.gmra.mrb[24].mxu1 %vm225_vm3, %v2321_v61  ;;  %v2446_v55 = vmul.f32 %v2550_v13, %v2431_v17 }
0x1660   :  { %v2466_v34 = vsel %vm225_vm3, %v2446_v55, 0.0 }
0x1729   :  { %v2218_v62 = vpop.f32.mrb[22].mxu1 }
0x172a   :  { %v2936_v57 = vpop.f32.mrb[23].mxu1 }
0x1731   :  { %v2390_v63 = vpop.f32.mrb[24].mxu1 }
0x1732   :  { %v2391_v0 = vadd.f32 %v2390_v63, %v2218_v62  ;;  %v2958_v3 = vpop.f32.mrb[25].mxu1 }
0x1734   :  { %v2394_v53 = vadd.f32 %v3481_v59, %v2391_v0  ;;  %v2425_v59 = vld [vmem:[#allocation3] sm:$0xff] }
0x1735   :  { %v2440_v15 = vmul.f32 %v2550_v13, %v2425_v59 }
0x1736   :  { %3231 = vtanh.f32 %v2394_v53  ;;  %v2549_v40 = vmul.f32 -1.442695, %v2394_v53 }
0x1737   :  { %v2448_v18 = vsel %vm225_vm3, %v2440_v15, 0.0 }
0x1738   :  { %3233 = vpow2.f32 %v2549_v40 }
0x1740   :  { %v3232_v4 = vpop.eup %3231 }
0x1741   :  { %2404 = vrot.lane.b32.xlu0 %v3232_v4, %s3269_s16 }
0x1742   :  { %v3234_v2 = vpop.eup %3233 }
0x1743   :  { %v2398_v1 = vadd.f32 1.0, %v3234_v2 }
0x1745   :  { %3235 = vrcp.f32 %v2398_v1 }
0x174f   :  { %v3236_v46 = vpop.eup %3235 }
0x1750   :  { %v2402_v8 = vmul.f32 %v3236_v46, %v2137_v45 }
0x17b3   :  { %v2405_v5 = vpop.permute.xlu0 %2404 }
0x17b4   :  { %v2407_v7 = vmul.f32 %v3236_v46, %v2405_v5 }
0x17b6   :  { %2409 = vrot.lane.b32.xlu1 %v2407_v7, %s3270_s2 }
0x1828   :  { %v2410_v9 = vpop.permute.xlu1 %2409 }
0x1829   :  { %v2412_v11 = vadd.f32 %v2410_v9, %v2402_v8 }
0x182b   :  { %3237 = vtanh.f32 %v2412_v11 }
0x1835   :  { %v3238_v12 = vpop.eup %3237 }
0x1836   :  { %2415 = vrot.lane.b32.xlu0 %v3238_v12, %s3269_s16 }
0x1855   :  { %2449 = vadd.xlane.f32.xlu0 %v2448_v18 }
0x1859   :  { %2455 = vadd.xlane.f32.xlu0 %v2454_v20 }
0x185d   :  { %2458 = vadd.xlane.f32.xlu0 %v2457_v24 }
0x1861   :  { %2464 = vadd.xlane.f32.xlu0 %v2463_v26 }
0x18a8   :  { %v2416_v27 = vpop.permute.xlu0 %2415 }
0x18a9   :  { %v2418_v28 = vmul.f32 %v3236_v46, %v2416_v27 }
0x18ab   :  { %2420 = vrot.lane.b32.xlu1 %v2418_v28, %s3270_s2 }
0x18cf   :  { %2452 = vadd.xlane.f32.xlu1 %v2451_v31 }
0x18d3   :  { %2461 = vadd.xlane.f32.xlu1 %v2460_v33 }
0x18d7   :  { %2467 = vadd.xlane.f32.xlu1 %v2466_v34 }
0x18e2   :  { %v2450_v37 = vpop.xlane.xlu0 %2449 }
0x18e3   :  { %v2479_v36 = vadd.f32 %v2551_v35, %v2450_v37 }
0x18e5   :  { %2488 = vst.msk [vmem:[%s3801_s9] sm:$0xff] %vm2487_vm4, %v2479_v36 }
0x18e6   :  { %v2456_v22 = vpop.xlane.xlu0 %2455 }
0x18e7   :  { %v2481_v56 = vadd.f32 %v2551_v35, %v2456_v22 }
0x18e9   :  { %2490 = vst.msk [vmem:[%s3801_s9 + $0x10] sm:$0xff] %vm2487_vm4, %v2481_v56 }
0x18ea   :  { %v2459_v38 = vpop.xlane.xlu0 %2458 }
0x18eb   :  { %v2482_v39 = vadd.f32 %v2551_v35, %v2459_v38 }
0x18ed   :  { %2491 = vst.msk [vmem:[%s3801_s9 + $0x18] sm:$0xff] %vm2487_vm4, %v2482_v39 }
0x18ee   :  { %v2465_v41 = vpop.xlane.xlu0 %2464 }
0x18ef   :  { %v2484_v42 = vadd.f32 %v2551_v35, %v2465_v41 }
0x18f1   :  { %2493 = vst.msk [vmem:[%s3801_s9 + $0x28] sm:$0xff] %vm2487_vm4, %v2484_v42 }
0x191d   :  { %v2421_v43 = vpop.permute.xlu1 %2420 }
0x191e   :  { %2424 = vst.msk [vmem:[#allocation3 + $0x38] sm:$0xff] %vm225_vm3, %v2421_v43 }
0x1925   :  { %v2432_v44 = vld [vmem:[#allocation3 + $0x38] sm:$0xff] }
0x1926   :  { %v2447_v45 = vmul.f32 %v2550_v13, %v2432_v44 }
0x1928   :  { %v2469_v6 = vsel %vm225_vm3, %v2447_v45, 0.0 }
0x1929   :  { %2470 = vadd.xlane.f32.xlu0 %v2469_v6 }
0x195c   :  { %v2453_v47 = vpop.xlane.xlu1 %2452 }
0x195d   :  { %v2480_v52 = vadd.f32 %v2551_v35, %v2453_v47 }
0x195f   :  { %2489 = vst.msk [vmem:[%s3801_s9 + $0x8] sm:$0xff] %vm2487_vm4, %v2480_v52 }
0x1960   :  { %v2462_v48 = vpop.xlane.xlu1 %2461 }
0x1961   :  { %v2483_v49 = vadd.f32 %v2551_v35, %v2462_v48 }
0x1963   :  { %2492 = vst.msk [vmem:[%s3801_s9 + $0x20] sm:$0xff] %vm2487_vm4, %v2483_v49 }
0x1964   :  { %v2468_v10 = vpop.xlane.xlu1 %2467 }
0x1965   :  { %v2485_v50 = vadd.f32 %v2551_v35, %v2468_v10 }
0x1967   :  { %2494 = vst.msk [vmem:[%s3801_s9 + $0x30] sm:$0xff] %vm2487_vm4, %v2485_v50 }
0x19b6   :  { %v2471_v51 = vpop.xlane.xlu0 %2470 }
0x19b7   :  { %v2486_v58 = vadd.f32 %v2551_v35, %v2471_v51 }
0x19b9   :  { %2495 = vst.msk [vmem:[%s3801_s9 + $0x38] sm:$0xff] %vm2487_vm4, %v2486_v58 }
0x19ba   :  { %2500 = vsyncpa [#allocation6], 1 }

</bundles_post_ra>
